<compile_context>
chip_gen: v7x
topology: tpu7x:2x2x1
jax: 0.10.0
libtpu: 0.0.40
codegen_flags: <defaults>
</compile_context>

<pallas_src>
import functools

import jax
import jax.numpy as jnp
from jax import lax
from jax.experimental import pallas as pl
from jax.experimental.pallas import tpu as pltpu


# --------------------------------------------------------------------------
# Weight packing: one lane-dense f32 slab (single DMA), static row layout.
# --------------------------------------------------------------------------
def _pack_weight_slab(layers, fc_w, fc_b):
    """Row layout per layer l (cin = layer input channels, H = hidden):
         [r     : r+2     , :H     ]  w1    (Linear(2,H) weight)
         [r+2   : r+3     , :H     ]  b1
         [r+3   : r+3+H   , :cin*H ]  w2    (Linear(H,cin*H) weight, lane-dense)
         [r+3+H : r+4+H   , :cin*H ]  b2
         [r+4+H : +cin    , :H     ]  root  (NNConv root weight)
         [r+4+H+cin       , :H     ]  bias  (NNConv bias)
       FC head at row fc_row:
         [fc_row      : +H , :out]  fc_w[:H]   (ligand half)
         [fc_row+H    : +H , :out]  fc_w[H:]   (receptor half)
         [fc_row+2H        , :out]  fc_b
    """
    hdim = layers[0]["root"].shape[1]
    out_dim = fc_w.shape[1]
    width = max([hdim, out_dim, 2] + [p["root"].shape[0] * hdim for p in layers])
    width = ((width + 127) // 128) * 128          # lane-dense slab

    def pad_w(a):
        a = a.astype(jnp.float32)
        return jnp.pad(a, ((0, 0), (0, width - a.shape[1])))

    blocks, layer_rows, r = [], [], 0
    for p in layers:
        cin = p["root"].shape[0]
        layer_rows.append(r)
        blocks += [pad_w(p["w1"]), pad_w(p["b1"]), pad_w(p["w2"]), pad_w(p["b2"]),
                   pad_w(p["root"]), pad_w(p["bias"])]
        r += hdim + cin + 5
    fc_row = r
    blocks += [pad_w(fc_w), pad_w(fc_b)]
    r += 2 * hdim + 1
    slab = jnp.concatenate(blocks, axis=0)
    slab = jnp.pad(slab, ((0, (-r) % 8), (0, 0)))   # sublane-align rows
    return slab, tuple(layer_rows), fc_row


# --------------------------------------------------------------------------
# Fused kernel: one batched GCN stack over the block-diagonal union of the
# two graphs (weights shared) + pair gather + FC head + sigmoid.
# --------------------------------------------------------------------------
def _make_fused_kernel(num_layers, in_dim, hdim, out_dim, layer_rows, fc_row):
    f32 = jnp.float32

    def sigmoid(x):
        # sigmoid(x) == 0.5 * tanh(0.5 * x) + 0.5 (exact identity, EUP tanh).
        return 0.5 * jnp.tanh(0.5 * x) + 0.5

    def kernel(x_ref, ea_ref, eidx_ref, sidx_ref, w_ref, out_ref):
        H = hdim
        N = x_ref.shape[0]
        E = ea_ref.shape[0]
        P = sidx_ref.shape[0]

        # Build gather / scatter one-hots in-kernel from int32 index columns
        # (VPU compare against iota) -- no (E,N) f32 HBM traffic.
        lane_n = lax.broadcasted_iota(jnp.int32, (E, N), 1)
        gsrc = (eidx_ref[:, 0:1] == lane_n).astype(f32)            # (E, N)
        gtgt = (eidx_ref[:, 1:2] == lane_n).astype(f32)            # (E, N)

        x = x_ref[...].astype(f32)                                  # (N, cin)
        ea = ea_ref[...].astype(f32)                                # (E, 2)

        cin = in_dim
        for l in range(num_layers):
            r = layer_rows[l]
            # Static slices of the packed weight slab.
            w1   = w_ref[r:r + 2, 0:H]                              # (2, H)
            b1   = w_ref[r + 2:r + 3, 0:H]                          # (1, H)
            w2   = w_ref[r + 3:r + 3 + H, 0:cin * H]                # (H, cin*H)
            b2   = w_ref[r + 3 + H:r + 4 + H, 0:cin * H]            # (1, cin*H)
            root = w_ref[r + 4 + H:r + 4 + H + cin, 0:H]            # (cin, H)
            bias = w_ref[r + 4 + H + cin:r + 5 + H + cin, 0:H]      # (1, H)

            # Edge MLP hidden layer: (E,2)@(2,H) + b1, ReLU.
            h1 = jnp.maximum(
                jnp.dot(ea, w1, preferred_element_type=f32) + b1, 0.0)    # (E, H)
            # Gather source-node features via one-hot matmul.
            x_src = jnp.dot(gsrc, x, preferred_element_type=f32)          # (E, cin)
            # Full per-edge weight in ONE lane-dense MXU matmul
            # (was: cin serially-dependent (E,H)@(H,H) matmuls).
            w_e = jnp.dot(h1, w2, preferred_element_type=f32) + b2        # (E, cin*H)
            # msgs[e,h] = sum_i x_src[e,i] * w_e[e, i*H + h]  (cheap VPU fma chain)
            msgs = x_src[:, 0:1] * w_e[:, 0:H]
            for i in range(1, cin):
                msgs = msgs + x_src[:, i:i + 1] * w_e[:, i * H:(i + 1) * H]
            # Scatter-add onto target nodes: contract the (E,N) target one-hot
            # over its E axis (transposed-LHS matmul on the MXU).
            agg = lax.dot_general(gtgt, msgs, (((0,), (0,)), ((), ())),
                                  preferred_element_type=f32)             # (N, H)
            x = sigmoid(agg + jnp.dot(x, root, preferred_element_type=f32) + bias)
            cin = H

        # FC head: gather the (ligand, receptor) pair rows from the combined
        # node table via one-hot matmuls, split-weight Linear, sigmoid.
        lane_p = lax.broadcasted_iota(jnp.int32, (P, N), 1)
        sel_l = (sidx_ref[:, 0:1] == lane_p).astype(f32)            # (P, N)
        sel_r = (sidx_ref[:, 1:2] == lane_p).astype(f32)            # (P, N)
        hl = jnp.dot(sel_l, x, preferred_element_type=f32)          # (P, H)
        hr = jnp.dot(sel_r, x, preferred_element_type=f32)          # (P, H)

        wa  = w_ref[fc_row:fc_row + H, 0:out_dim]                   # (H, out)
        wb  = w_ref[fc_row + H:fc_row + 2 * H, 0:out_dim]           # (H, out)
        fcb = w_ref[fc_row + 2 * H:fc_row + 2 * H + 1, 0:out_dim]   # (1, out)
        pre = (jnp.dot(hl, wa, preferred_element_type=f32)
               + jnp.dot(hr, wb, preferred_element_type=f32) + fcb)
        out_ref[...] = sigmoid(pre)
        # TODO(synk): output is only out_dim(=2) lanes wide; nothing further to
        # make lane-dense without changing the module's output shape.

    return kernel


# --------------------------------------------------------------------------
# Wrapper: block-diagonal graph fusion + index packing + single pallas_call.
# --------------------------------------------------------------------------
def ffn_gcns_forward(params, x1, edge_index1, edge_attr1,
                     x2, edge_index2, edge_attr2, label):
    layers = params["gcn"]
    num_layers = len(layers)
    in_dim, hdim = layers[0]["root"].shape
    out_dim = params["fc_w"].shape[1]

    n1 = x1.shape[0]
    # Block-diagonal fusion: weights are shared and the graphs are disjoint,
    # so one batched pass over (N1+N2, E1+E2) equals two sequential stacks.
    x = jnp.concatenate([x1, x2], axis=0).astype(jnp.float32)                  # (N, in)
    ea = jnp.concatenate([edge_attr1, edge_attr2], axis=0).astype(jnp.float32)  # (E, 2)
    eidx = jnp.concatenate(
        [edge_index1.T, edge_index2.T + n1], axis=0).astype(jnp.int32)          # (E, 2)
    sidx = jnp.stack(
        [label[:, 0], label[:, 1] + n1], axis=1).astype(jnp.int32)              # (P, 2)

    slab, layer_rows, fc_row = _pack_weight_slab(layers, params["fc_w"],
                                                 params["fc_b"])

    kernel = _make_fused_kernel(num_layers, in_dim, hdim, out_dim,
                                layer_rows, fc_row)
    vmem = pl.BlockSpec(memory_space=pltpu.MemorySpace.VMEM)
    return pl.pallas_call(
        kernel,
        out_shape=jax.ShapeDtypeStruct((label.shape[0], out_dim), jnp.float32),
        in_specs=[vmem] * 5,
        out_specs=vmem,
    )(x, ea, eidx, sidx, slab)


# --------------------------------------------------------------------------
# Deterministic parameter init (shapes follow the torch module __init__)
# --------------------------------------------------------------------------
def _dense(key, fan_in, fan_out):
    k1, k2 = jax.random.split(key)
    w = jax.random.normal(k1, (fan_in, fan_out), jnp.float32) / jnp.sqrt(float(fan_in))
    b = 0.01 * jax.random.normal(k2, (1, fan_out), jnp.float32)
    return w, b


def init_params(key, in_dim, hidden_dim, out_dim, num_layers):
    keys = jax.random.split(key, num_layers + 1)
    layers = []
    cin = in_dim
    for l in range(num_layers):
        k = jax.random.split(keys[l], 3)
        w1, b1 = _dense(k[0], 2, hidden_dim)                     # Linear(2, H)
        w2, b2 = _dense(k[1], hidden_dim, cin * hidden_dim)      # Linear(H, cin*H)
        root, bias = _dense(k[2], cin, hidden_dim)               # NNConv root + bias
        layers.append(dict(w1=w1, b1=b1, w2=w2, b2=b2, root=root, bias=bias))
        cin = hidden_dim
    fc_w, fc_b = _dense(keys[-1], 2 * hidden_dim, out_dim)       # Linear(2H, out)
    return dict(gcn=layers, fc_w=fc_w, fc_b=fc_b)


# --------------------------------------------------------------------------
# Pure-JAX reference (scatter/gather form) for correctness checking
# --------------------------------------------------------------------------
def _nnconv_ref(x, edge_index, edge_attr, p):
    h = jnp.maximum(edge_attr @ p["w1"] + p["b1"], 0.0)
    w_e = h @ p["w2"] + p["b2"]
    cin, hdim = x.shape[1], p["root"].shape[1]
    w_e = w_e.reshape(-1, cin, hdim)
    x_src = x[edge_index[0]]
    msgs = jnp.einsum("ec,ech->eh", x_src, w_e)
    agg = jax.ops.segment_sum(msgs, edge_index[1], num_segments=x.shape[0])
    return jax.nn.sigmoid(agg + x @ p["root"] + p["bias"])


def _forward_ref(params, x1, ei1, ea1, x2, ei2, ea2, label):
    xl, xr = x1, x2
    for p in params["gcn"]:
        xl = _nnconv_ref(xl, ei1, ea1, p)
    for p in params["gcn"]:
        xr = _nnconv_ref(xr, ei2, ea2, p)
    cat = jnp.concatenate([xl[label[:, 0]], xr[label[:, 1]]], axis=1)
    return jax.nn.sigmoid(cat @ params["fc_w"] + params["fc_b"])


# --------------------------------------------------------------------------
if __name__ == "__main__":
    in_dim, hidden_dim, out_dim, num_layers, dropout = 4, 16, 2, 2, 0.1
    n1, e1 = 16, 32   # ligand graph
    n2, e2 = 12, 24   # receptor graph
    n_pairs = 8

    key = jax.random.PRNGKey(0)
    kp, kx1, kx2, kei1, kei2, kea1, kea2, klab = jax.random.split(key, 8)

    params = init_params(kp, in_dim, hidden_dim, out_dim, num_layers)

    x1 = jax.random.normal(kx1, (n1, in_dim), jnp.float32)
    x2 = jax.random.normal(kx2, (n2, in_dim), jnp.float32)
    edge_index1 = jax.random.randint(kei1, (2, e1), 0, n1, dtype=jnp.int32)
    edge_index2 = jax.random.randint(kei2, (2, e2), 0, n2, dtype=jnp.int32)
    edge_attr1 = jax.random.normal(kea1, (e1, 2), jnp.float32)
    edge_attr2 = jax.random.normal(kea2, (e2, 2), jnp.float32)
    lab0 = jax.random.randint(klab, (n_pairs,), 0, n1, dtype=jnp.int32)
    lab1 = jax.random.randint(jax.random.fold_in(klab, 1), (n_pairs,), 0, n2,
                              dtype=jnp.int32)
    label = jnp.stack([lab0, lab1], axis=1)                       # (P, 2)

    fwd = jax.jit(functools.partial(ffn_gcns_forward, params))
    out = fwd(x1, edge_index1, edge_attr1, x2, edge_index2, edge_attr2, label)
    out = jax.block_until_ready(out)

    ref = _forward_ref(params, x1, edge_index1, edge_attr1,
                       x2, edge_index2, edge_attr2, label)
    assert out.shape == (n_pairs, out_dim), out.shape
    assert jnp.allclose(out, ref, atol=1e-4, rtol=1e-4), \
        f"max err {jnp.max(jnp.abs(out - ref))}"

    print("KERNEL_OK")
</pallas_src>

<mosaic_0001>
module attributes {stable_mosaic.version = 11 : i64} {
  func.func @kernel(%arg0: memref<28x4xf32, #tpu.memory_space<vmem>>, %arg1: memref<56x2xf32, #tpu.memory_space<vmem>>, %arg2: memref<56x2xi32, #tpu.memory_space<vmem>>, %arg3: memref<8x2xi32, #tpu.memory_space<vmem>>, %arg4: memref<96x256xf32, #tpu.memory_space<vmem>>, %arg5: memref<8x2xf32, #tpu.memory_space<vmem>>) attributes {dimension_semantics = [], scalar_prefetch = 0 : i64, scratch_operands = 0 : i64, tpu.core_type = #tpu.core_type<tc>} {
    %0 = tpu.iota {dimensions = array<i32: 1>} : vector<56x28xi32>
    %c0 = arith.constant 0 : index
    %c0_0 = arith.constant 0 : index
    %1 = vector.load %arg2[%c0, %c0_0] : memref<56x2xi32, #tpu.memory_space<vmem>>, vector<56x1xi32>
    %2 = vector.broadcast %1 : vector<56x1xi32> to vector<56x28xi32>
    %3 = arith.cmpi eq, %2, %0 : vector<56x28xi32>
    %4 = arith.extui %3 : vector<56x28xi1> to vector<56x28xi32>
    %5 = arith.sitofp %4 : vector<56x28xi32> to vector<56x28xf32>
    %c0_1 = arith.constant 0 : index
    %c1 = arith.constant 1 : index
    %6 = vector.load %arg2[%c0_1, %c1] : memref<56x2xi32, #tpu.memory_space<vmem>>, vector<56x1xi32>
    %7 = vector.broadcast %6 : vector<56x1xi32> to vector<56x28xi32>
    %8 = arith.cmpi eq, %7, %0 : vector<56x28xi32>
    %9 = arith.extui %8 : vector<56x28xi1> to vector<56x28xi32>
    %10 = arith.sitofp %9 : vector<56x28xi32> to vector<56x28xf32>
    %c0_2 = arith.constant 0 : index
    %c0_3 = arith.constant 0 : index
    %11 = vector.load %arg0[%c0_2, %c0_3] : memref<28x4xf32, #tpu.memory_space<vmem>>, vector<28x4xf32>
    %c0_4 = arith.constant 0 : index
    %c0_5 = arith.constant 0 : index
    %12 = vector.load %arg1[%c0_4, %c0_5] : memref<56x2xf32, #tpu.memory_space<vmem>>, vector<56x2xf32>
    %c0_6 = arith.constant 0 : index
    %c0_7 = arith.constant 0 : index
    %13 = vector.load %arg4[%c0_6, %c0_7] : memref<96x256xf32, #tpu.memory_space<vmem>>, vector<2x16xf32>
    %c2 = arith.constant 2 : index
    %c0_8 = arith.constant 0 : index
    %14 = vector.load %arg4[%c2, %c0_8] : memref<96x256xf32, #tpu.memory_space<vmem>>, vector<1x16xf32>
    %c3 = arith.constant 3 : index
    %c0_9 = arith.constant 0 : index
    %15 = vector.load %arg4[%c3, %c0_9] : memref<96x256xf32, #tpu.memory_space<vmem>>, vector<16x64xf32>
    %c19 = arith.constant 19 : index
    %c0_10 = arith.constant 0 : index
    %16 = vector.load %arg4[%c19, %c0_10] : memref<96x256xf32, #tpu.memory_space<vmem>>, vector<1x64xf32>
    %c20 = arith.constant 20 : index
    %c0_11 = arith.constant 0 : index
    %17 = vector.load %arg4[%c20, %c0_11] : memref<96x256xf32, #tpu.memory_space<vmem>>, vector<4x16xf32>
    %c24 = arith.constant 24 : index
    %c0_12 = arith.constant 0 : index
    %18 = vector.load %arg4[%c24, %c0_12] : memref<96x256xf32, #tpu.memory_space<vmem>>, vector<1x16xf32>
    %cst = arith.constant dense<0.000000e+00> : vector<56x16xf32>
    %19 = tpu.matmul %12, %13, %cst {dimension_numbers = #tpu.dot_dimension_numbers<[1], [0], [0], [1], [0, 0, 1, 1], [], []>} : vector<56x2xf32>, vector<2x16xf32>, vector<56x16xf32> -> vector<56x16xf32>
    %20 = vector.broadcast %14 : vector<1x16xf32> to vector<56x16xf32>
    %21 = arith.addf %19, %20 : vector<56x16xf32>
    %cst_13 = arith.constant 0.000000e+00 : f32
    %22 = vector.broadcast %cst_13 : f32 to vector<56x16xf32>
    %23 = arith.maximumf %21, %22 : vector<56x16xf32>
    %cst_14 = arith.constant dense<0.000000e+00> : vector<56x4xf32>
    %24 = tpu.matmul %5, %11, %cst_14 {dimension_numbers = #tpu.dot_dimension_numbers<[1], [0], [0], [1], [0, 0, 1, 1], [], []>} : vector<56x28xf32>, vector<28x4xf32>, vector<56x4xf32> -> vector<56x4xf32>
    %cst_15 = arith.constant dense<0.000000e+00> : vector<56x64xf32>
    %25 = tpu.matmul %23, %15, %cst_15 {dimension_numbers = #tpu.dot_dimension_numbers<[1], [0], [0], [1], [0, 0, 1, 1], [], []>} : vector<56x16xf32>, vector<16x64xf32>, vector<56x64xf32> -> vector<56x64xf32>
    %26 = vector.broadcast %16 : vector<1x64xf32> to vector<56x64xf32>
    %27 = arith.addf %25, %26 : vector<56x64xf32>
    %28 = vector.extract_strided_slice %24 {offsets = [0, 0], sizes = [56, 1], strides = [1, 1]} : vector<56x4xf32> to vector<56x1xf32>
    %29 = vector.extract_strided_slice %27 {offsets = [0, 0], sizes = [56, 16], strides = [1, 1]} : vector<56x64xf32> to vector<56x16xf32>
    %30 = vector.broadcast %28 : vector<56x1xf32> to vector<56x16xf32>
    %31 = arith.mulf %30, %29 : vector<56x16xf32>
    %32 = vector.extract_strided_slice %24 {offsets = [0, 1], sizes = [56, 1], strides = [1, 1]} : vector<56x4xf32> to vector<56x1xf32>
    %33 = vector.extract_strided_slice %27 {offsets = [0, 16], sizes = [56, 16], strides = [1, 1]} : vector<56x64xf32> to vector<56x16xf32>
    %34 = vector.broadcast %32 : vector<56x1xf32> to vector<56x16xf32>
    %35 = arith.mulf %34, %33 : vector<56x16xf32>
    %36 = arith.addf %31, %35 : vector<56x16xf32>
    %37 = vector.extract_strided_slice %24 {offsets = [0, 2], sizes = [56, 1], strides = [1, 1]} : vector<56x4xf32> to vector<56x1xf32>
    %38 = vector.extract_strided_slice %27 {offsets = [0, 32], sizes = [56, 16], strides = [1, 1]} : vector<56x64xf32> to vector<56x16xf32>
    %39 = vector.broadcast %37 : vector<56x1xf32> to vector<56x16xf32>
    %40 = arith.mulf %39, %38 : vector<56x16xf32>
    %41 = arith.addf %36, %40 : vector<56x16xf32>
    %42 = vector.extract_strided_slice %24 {offsets = [0, 3], sizes = [56, 1], strides = [1, 1]} : vector<56x4xf32> to vector<56x1xf32>
    %43 = vector.extract_strided_slice %27 {offsets = [0, 48], sizes = [56, 16], strides = [1, 1]} : vector<56x64xf32> to vector<56x16xf32>
    %44 = vector.broadcast %42 : vector<56x1xf32> to vector<56x16xf32>
    %45 = arith.mulf %44, %43 : vector<56x16xf32>
    %46 = arith.addf %41, %45 : vector<56x16xf32>
    %cst_16 = arith.constant dense<0.000000e+00> : vector<28x16xf32>
    %47 = tpu.matmul %10, %46, %cst_16 {dimension_numbers = #tpu.dot_dimension_numbers<[0], [0], [1], [1], [0, 1, 1, 1], [], []>} : vector<56x28xf32>, vector<56x16xf32>, vector<28x16xf32> -> vector<28x16xf32>
    %cst_17 = arith.constant dense<0.000000e+00> : vector<28x16xf32>
    %48 = tpu.matmul %11, %17, %cst_17 {dimension_numbers = #tpu.dot_dimension_numbers<[1], [0], [0], [1], [0, 0, 1, 1], [], []>} : vector<28x4xf32>, vector<4x16xf32>, vector<28x16xf32> -> vector<28x16xf32>
    %49 = arith.addf %47, %48 : vector<28x16xf32>
    %50 = vector.broadcast %18 : vector<1x16xf32> to vector<28x16xf32>
    %51 = arith.addf %49, %50 : vector<28x16xf32>
    %cst_18 = arith.constant 5.000000e-01 : f32
    %52 = vector.broadcast %cst_18 : f32 to vector<28x16xf32>
    %53 = arith.mulf %52, %51 : vector<28x16xf32>
    %54 = math.tanh %53 : vector<28x16xf32>
    %cst_19 = arith.constant 5.000000e-01 : f32
    %55 = vector.broadcast %cst_19 : f32 to vector<28x16xf32>
    %56 = arith.mulf %55, %54 : vector<28x16xf32>
    %cst_20 = arith.constant 5.000000e-01 : f32
    %57 = vector.broadcast %cst_20 : f32 to vector<28x16xf32>
    %58 = arith.addf %56, %57 : vector<28x16xf32>
    %c25 = arith.constant 25 : index
    %c0_21 = arith.constant 0 : index
    %59 = vector.load %arg4[%c25, %c0_21] : memref<96x256xf32, #tpu.memory_space<vmem>>, vector<2x16xf32>
    %c27 = arith.constant 27 : index
    %c0_22 = arith.constant 0 : index
    %60 = vector.load %arg4[%c27, %c0_22] : memref<96x256xf32, #tpu.memory_space<vmem>>, vector<1x16xf32>
    %c28 = arith.constant 28 : index
    %c0_23 = arith.constant 0 : index
    %61 = vector.load %arg4[%c28, %c0_23] : memref<96x256xf32, #tpu.memory_space<vmem>>, vector<16x256xf32>
    %c44 = arith.constant 44 : index
    %c0_24 = arith.constant 0 : index
    %62 = vector.load %arg4[%c44, %c0_24] : memref<96x256xf32, #tpu.memory_space<vmem>>, vector<1x256xf32>
    %c45 = arith.constant 45 : index
    %c0_25 = arith.constant 0 : index
    %63 = vector.load %arg4[%c45, %c0_25] : memref<96x256xf32, #tpu.memory_space<vmem>>, vector<16x16xf32>
    %c61 = arith.constant 61 : index
    %c0_26 = arith.constant 0 : index
    %64 = vector.load %arg4[%c61, %c0_26] : memref<96x256xf32, #tpu.memory_space<vmem>>, vector<1x16xf32>
    %cst_27 = arith.constant dense<0.000000e+00> : vector<56x16xf32>
    %65 = tpu.matmul %12, %59, %cst_27 {dimension_numbers = #tpu.dot_dimension_numbers<[1], [0], [0], [1], [0, 0, 1, 1], [], []>} : vector<56x2xf32>, vector<2x16xf32>, vector<56x16xf32> -> vector<56x16xf32>
    %66 = vector.broadcast %60 : vector<1x16xf32> to vector<56x16xf32>
    %67 = arith.addf %65, %66 : vector<56x16xf32>
    %cst_28 = arith.constant 0.000000e+00 : f32
    %68 = vector.broadcast %cst_28 : f32 to vector<56x16xf32>
    %69 = arith.maximumf %67, %68 : vector<56x16xf32>
    %cst_29 = arith.constant dense<0.000000e+00> : vector<56x16xf32>
    %70 = tpu.matmul %5, %58, %cst_29 {dimension_numbers = #tpu.dot_dimension_numbers<[1], [0], [0], [1], [0, 0, 1, 1], [], []>} : vector<56x28xf32>, vector<28x16xf32>, vector<56x16xf32> -> vector<56x16xf32>
    %cst_30 = arith.constant dense<0.000000e+00> : vector<56x256xf32>
    %71 = tpu.matmul %69, %61, %cst_30 {dimension_numbers = #tpu.dot_dimension_numbers<[1], [0], [0], [1], [0, 0, 1, 1], [], []>} : vector<56x16xf32>, vector<16x256xf32>, vector<56x256xf32> -> vector<56x256xf32>
    %72 = vector.broadcast %62 : vector<1x256xf32> to vector<56x256xf32>
    %73 = arith.addf %71, %72 : vector<56x256xf32>
    %74 = vector.extract_strided_slice %70 {offsets = [0, 0], sizes = [56, 1], strides = [1, 1]} : vector<56x16xf32> to vector<56x1xf32>
    %75 = vector.extract_strided_slice %73 {offsets = [0, 0], sizes = [56, 16], strides = [1, 1]} : vector<56x256xf32> to vector<56x16xf32>
    %76 = vector.broadcast %74 : vector<56x1xf32> to vector<56x16xf32>
    %77 = arith.mulf %76, %75 : vector<56x16xf32>
    %78 = vector.extract_strided_slice %70 {offsets = [0, 1], sizes = [56, 1], strides = [1, 1]} : vector<56x16xf32> to vector<56x1xf32>
    %79 = vector.extract_strided_slice %73 {offsets = [0, 16], sizes = [56, 16], strides = [1, 1]} : vector<56x256xf32> to vector<56x16xf32>
    %80 = vector.broadcast %78 : vector<56x1xf32> to vector<56x16xf32>
    %81 = arith.mulf %80, %79 : vector<56x16xf32>
    %82 = arith.addf %77, %81 : vector<56x16xf32>
    %83 = vector.extract_strided_slice %70 {offsets = [0, 2], sizes = [56, 1], strides = [1, 1]} : vector<56x16xf32> to vector<56x1xf32>
    %84 = vector.extract_strided_slice %73 {offsets = [0, 32], sizes = [56, 16], strides = [1, 1]} : vector<56x256xf32> to vector<56x16xf32>
    %85 = vector.broadcast %83 : vector<56x1xf32> to vector<56x16xf32>
    %86 = arith.mulf %85, %84 : vector<56x16xf32>
    %87 = arith.addf %82, %86 : vector<56x16xf32>
    %88 = vector.extract_strided_slice %70 {offsets = [0, 3], sizes = [56, 1], strides = [1, 1]} : vector<56x16xf32> to vector<56x1xf32>
    %89 = vector.extract_strided_slice %73 {offsets = [0, 48], sizes = [56, 16], strides = [1, 1]} : vector<56x256xf32> to vector<56x16xf32>
    %90 = vector.broadcast %88 : vector<56x1xf32> to vector<56x16xf32>
    %91 = arith.mulf %90, %89 : vector<56x16xf32>
    %92 = arith.addf %87, %91 : vector<56x16xf32>
    %93 = vector.extract_strided_slice %70 {offsets = [0, 4], sizes = [56, 1], strides = [1, 1]} : vector<56x16xf32> to vector<56x1xf32>
    %94 = vector.extract_strided_slice %73 {offsets = [0, 64], sizes = [56, 16], strides = [1, 1]} : vector<56x256xf32> to vector<56x16xf32>
    %95 = vector.broadcast %93 : vector<56x1xf32> to vector<56x16xf32>
    %96 = arith.mulf %95, %94 : vector<56x16xf32>
    %97 = arith.addf %92, %96 : vector<56x16xf32>
    %98 = vector.extract_strided_slice %70 {offsets = [0, 5], sizes = [56, 1], strides = [1, 1]} : vector<56x16xf32> to vector<56x1xf32>
    %99 = vector.extract_strided_slice %73 {offsets = [0, 80], sizes = [56, 16], strides = [1, 1]} : vector<56x256xf32> to vector<56x16xf32>
    %100 = vector.broadcast %98 : vector<56x1xf32> to vector<56x16xf32>
    %101 = arith.mulf %100, %99 : vector<56x16xf32>
    %102 = arith.addf %97, %101 : vector<56x16xf32>
    %103 = vector.extract_strided_slice %70 {offsets = [0, 6], sizes = [56, 1], strides = [1, 1]} : vector<56x16xf32> to vector<56x1xf32>
    %104 = vector.extract_strided_slice %73 {offsets = [0, 96], sizes = [56, 16], strides = [1, 1]} : vector<56x256xf32> to vector<56x16xf32>
    %105 = vector.broadcast %103 : vector<56x1xf32> to vector<56x16xf32>
    %106 = arith.mulf %105, %104 : vector<56x16xf32>
    %107 = arith.addf %102, %106 : vector<56x16xf32>
    %108 = vector.extract_strided_slice %70 {offsets = [0, 7], sizes = [56, 1], strides = [1, 1]} : vector<56x16xf32> to vector<56x1xf32>
    %109 = vector.extract_strided_slice %73 {offsets = [0, 112], sizes = [56, 16], strides = [1, 1]} : vector<56x256xf32> to vector<56x16xf32>
    %110 = vector.broadcast %108 : vector<56x1xf32> to vector<56x16xf32>
    %111 = arith.mulf %110, %109 : vector<56x16xf32>
    %112 = arith.addf %107, %111 : vector<56x16xf32>
    %113 = vector.extract_strided_slice %70 {offsets = [0, 8], sizes = [56, 1], strides = [1, 1]} : vector<56x16xf32> to vector<56x1xf32>
    %114 = vector.extract_strided_slice %73 {offsets = [0, 128], sizes = [56, 16], strides = [1, 1]} : vector<56x256xf32> to vector<56x16xf32>
    %115 = vector.broadcast %113 : vector<56x1xf32> to vector<56x16xf32>
    %116 = arith.mulf %115, %114 : vector<56x16xf32>
    %117 = arith.addf %112, %116 : vector<56x16xf32>
    %118 = vector.extract_strided_slice %70 {offsets = [0, 9], sizes = [56, 1], strides = [1, 1]} : vector<56x16xf32> to vector<56x1xf32>
    %119 = vector.extract_strided_slice %73 {offsets = [0, 144], sizes = [56, 16], strides = [1, 1]} : vector<56x256xf32> to vector<56x16xf32>
    %120 = vector.broadcast %118 : vector<56x1xf32> to vector<56x16xf32>
    %121 = arith.mulf %120, %119 : vector<56x16xf32>
    %122 = arith.addf %117, %121 : vector<56x16xf32>
    %123 = vector.extract_strided_slice %70 {offsets = [0, 10], sizes = [56, 1], strides = [1, 1]} : vector<56x16xf32> to vector<56x1xf32>
    %124 = vector.extract_strided_slice %73 {offsets = [0, 160], sizes = [56, 16], strides = [1, 1]} : vector<56x256xf32> to vector<56x16xf32>
    %125 = vector.broadcast %123 : vector<56x1xf32> to vector<56x16xf32>
    %126 = arith.mulf %125, %124 : vector<56x16xf32>
    %127 = arith.addf %122, %126 : vector<56x16xf32>
    %128 = vector.extract_strided_slice %70 {offsets = [0, 11], sizes = [56, 1], strides = [1, 1]} : vector<56x16xf32> to vector<56x1xf32>
    %129 = vector.extract_strided_slice %73 {offsets = [0, 176], sizes = [56, 16], strides = [1, 1]} : vector<56x256xf32> to vector<56x16xf32>
    %130 = vector.broadcast %128 : vector<56x1xf32> to vector<56x16xf32>
    %131 = arith.mulf %130, %129 : vector<56x16xf32>
    %132 = arith.addf %127, %131 : vector<56x16xf32>
    %133 = vector.extract_strided_slice %70 {offsets = [0, 12], sizes = [56, 1], strides = [1, 1]} : vector<56x16xf32> to vector<56x1xf32>
    %134 = vector.extract_strided_slice %73 {offsets = [0, 192], sizes = [56, 16], strides = [1, 1]} : vector<56x256xf32> to vector<56x16xf32>
    %135 = vector.broadcast %133 : vector<56x1xf32> to vector<56x16xf32>
    %136 = arith.mulf %135, %134 : vector<56x16xf32>
    %137 = arith.addf %132, %136 : vector<56x16xf32>
    %138 = vector.extract_strided_slice %70 {offsets = [0, 13], sizes = [56, 1], strides = [1, 1]} : vector<56x16xf32> to vector<56x1xf32>
    %139 = vector.extract_strided_slice %73 {offsets = [0, 208], sizes = [56, 16], strides = [1, 1]} : vector<56x256xf32> to vector<56x16xf32>
    %140 = vector.broadcast %138 : vector<56x1xf32> to vector<56x16xf32>
    %141 = arith.mulf %140, %139 : vector<56x16xf32>
    %142 = arith.addf %137, %141 : vector<56x16xf32>
    %143 = vector.extract_strided_slice %70 {offsets = [0, 14], sizes = [56, 1], strides = [1, 1]} : vector<56x16xf32> to vector<56x1xf32>
    %144 = vector.extract_strided_slice %73 {offsets = [0, 224], sizes = [56, 16], strides = [1, 1]} : vector<56x256xf32> to vector<56x16xf32>
    %145 = vector.broadcast %143 : vector<56x1xf32> to vector<56x16xf32>
    %146 = arith.mulf %145, %144 : vector<56x16xf32>
    %147 = arith.addf %142, %146 : vector<56x16xf32>
    %148 = vector.extract_strided_slice %70 {offsets = [0, 15], sizes = [56, 1], strides = [1, 1]} : vector<56x16xf32> to vector<56x1xf32>
    %149 = vector.extract_strided_slice %73 {offsets = [0, 240], sizes = [56, 16], strides = [1, 1]} : vector<56x256xf32> to vector<56x16xf32>
    %150 = vector.broadcast %148 : vector<56x1xf32> to vector<56x16xf32>
    %151 = arith.mulf %150, %149 : vector<56x16xf32>
    %152 = arith.addf %147, %151 : vector<56x16xf32>
    %cst_31 = arith.constant dense<0.000000e+00> : vector<28x16xf32>
    %153 = tpu.matmul %10, %152, %cst_31 {dimension_numbers = #tpu.dot_dimension_numbers<[0], [0], [1], [1], [0, 1, 1, 1], [], []>} : vector<56x28xf32>, vector<56x16xf32>, vector<28x16xf32> -> vector<28x16xf32>
    %cst_32 = arith.constant dense<0.000000e+00> : vector<28x16xf32>
    %154 = tpu.matmul %58, %63, %cst_32 {dimension_numbers = #tpu.dot_dimension_numbers<[1], [0], [0], [1], [0, 0, 1, 1], [], []>} : vector<28x16xf32>, vector<16x16xf32>, vector<28x16xf32> -> vector<28x16xf32>
    %155 = arith.addf %153, %154 : vector<28x16xf32>
    %156 = vector.broadcast %64 : vector<1x16xf32> to vector<28x16xf32>
    %157 = arith.addf %155, %156 : vector<28x16xf32>
    %cst_33 = arith.constant 5.000000e-01 : f32
    %158 = vector.broadcast %cst_33 : f32 to vector<28x16xf32>
    %159 = arith.mulf %158, %157 : vector<28x16xf32>
    %160 = math.tanh %159 : vector<28x16xf32>
    %cst_34 = arith.constant 5.000000e-01 : f32
    %161 = vector.broadcast %cst_34 : f32 to vector<28x16xf32>
    %162 = arith.mulf %161, %160 : vector<28x16xf32>
    %cst_35 = arith.constant 5.000000e-01 : f32
    %163 = vector.broadcast %cst_35 : f32 to vector<28x16xf32>
    %164 = arith.addf %162, %163 : vector<28x16xf32>
    %165 = tpu.iota {dimensions = array<i32: 1>} : vector<8x28xi32>
    %c0_36 = arith.constant 0 : index
    %c0_37 = arith.constant 0 : index
    %166 = vector.load %arg3[%c0_36, %c0_37] : memref<8x2xi32, #tpu.memory_space<vmem>>, vector<8x1xi32>
    %167 = vector.broadcast %166 : vector<8x1xi32> to vector<8x28xi32>
    %168 = arith.cmpi eq, %167, %165 : vector<8x28xi32>
    %169 = arith.extui %168 : vector<8x28xi1> to vector<8x28xi32>
    %170 = arith.sitofp %169 : vector<8x28xi32> to vector<8x28xf32>
    %c0_38 = arith.constant 0 : index
    %c1_39 = arith.constant 1 : index
    %171 = vector.load %arg3[%c0_38, %c1_39] : memref<8x2xi32, #tpu.memory_space<vmem>>, vector<8x1xi32>
    %172 = vector.broadcast %171 : vector<8x1xi32> to vector<8x28xi32>
    %173 = arith.cmpi eq, %172, %165 : vector<8x28xi32>
    %174 = arith.extui %173 : vector<8x28xi1> to vector<8x28xi32>
    %175 = arith.sitofp %174 : vector<8x28xi32> to vector<8x28xf32>
    %cst_40 = arith.constant dense<0.000000e+00> : vector<8x16xf32>
    %176 = tpu.matmul %170, %164, %cst_40 {dimension_numbers = #tpu.dot_dimension_numbers<[1], [0], [0], [1], [0, 0, 1, 1], [], []>} : vector<8x28xf32>, vector<28x16xf32>, vector<8x16xf32> -> vector<8x16xf32>
    %cst_41 = arith.constant dense<0.000000e+00> : vector<8x16xf32>
    %177 = tpu.matmul %175, %164, %cst_41 {dimension_numbers = #tpu.dot_dimension_numbers<[1], [0], [0], [1], [0, 0, 1, 1], [], []>} : vector<8x28xf32>, vector<28x16xf32>, vector<8x16xf32> -> vector<8x16xf32>
    %c62 = arith.constant 62 : index
    %c0_42 = arith.constant 0 : index
    %178 = vector.load %arg4[%c62, %c0_42] : memref<96x256xf32, #tpu.memory_space<vmem>>, vector<16x2xf32>
    %c78 = arith.constant 78 : index
    %c0_43 = arith.constant 0 : index
    %179 = vector.load %arg4[%c78, %c0_43] : memref<96x256xf32, #tpu.memory_space<vmem>>, vector<16x2xf32>
    %c94 = arith.constant 94 : index
    %c0_44 = arith.constant 0 : index
    %180 = vector.load %arg4[%c94, %c0_44] : memref<96x256xf32, #tpu.memory_space<vmem>>, vector<1x2xf32>
    %cst_45 = arith.constant dense<0.000000e+00> : vector<8x2xf32>
    %181 = tpu.matmul %176, %178, %cst_45 {dimension_numbers = #tpu.dot_dimension_numbers<[1], [0], [0], [1], [0, 0, 1, 1], [], []>} : vector<8x16xf32>, vector<16x2xf32>, vector<8x2xf32> -> vector<8x2xf32>
    %cst_46 = arith.constant dense<0.000000e+00> : vector<8x2xf32>
    %182 = tpu.matmul %177, %179, %cst_46 {dimension_numbers = #tpu.dot_dimension_numbers<[1], [0], [0], [1], [0, 0, 1, 1], [], []>} : vector<8x16xf32>, vector<16x2xf32>, vector<8x2xf32> -> vector<8x2xf32>
    %183 = arith.addf %181, %182 : vector<8x2xf32>
    %184 = vector.broadcast %180 : vector<1x2xf32> to vector<8x2xf32>
    %185 = arith.addf %183, %184 : vector<8x2xf32>
    %cst_47 = arith.constant 5.000000e-01 : f32
    %186 = vector.broadcast %cst_47 : f32 to vector<8x2xf32>
    %187 = arith.mulf %186, %185 : vector<8x2xf32>
    %188 = math.tanh %187 : vector<8x2xf32>
    %cst_48 = arith.constant 5.000000e-01 : f32
    %189 = vector.broadcast %cst_48 : f32 to vector<8x2xf32>
    %190 = arith.mulf %189, %188 : vector<8x2xf32>
    %cst_49 = arith.constant 5.000000e-01 : f32
    %191 = vector.broadcast %cst_49 : f32 to vector<8x2xf32>
    %192 = arith.addf %190, %191 : vector<8x2xf32>
    %c0_50 = arith.constant 0 : index
    %c0_51 = arith.constant 0 : index
    %193 = vector.load %arg5[%c0_50, %c0_51] : memref<8x2xf32, #tpu.memory_space<vmem>>, vector<8x2xf32>
    tpu.vector_store %arg5[%c0_50, %c0_51], %192 {strides = array<i32>} : memref<8x2xf32, #tpu.memory_space<vmem>>, vector<8x2xf32>,
    return
  }
}

</mosaic_0001>

<bundles_post_ra>
// kernel: ffn_gcns_forward.1
= control target key start
LH: loop header
LB: loop body
LE: loop exit
PB: predicated region body
PF: predicated region fallthrough
CT: control target
= control target key end

     0   :  { %v5182_v0 = vmov 0   ;;  %vm154_vm0 = vcmask 1041408   ;;  %vm132_vm1 = vcmask 15360   ;;  %v5168_v5 = vmov 0.0   ;;  %s3708_s13 = smov 112   ;;  %s3709_s16 = smov 96   ;;  %s5162_s2 = inlined_call_operand.vmem [shape: s32[56,2], index: 2, kind: input, shape index: {}]   ;;  %s5163_s4 = inlined_call_operand.vmem [shape: f32[96,256], index: 4, kind: input, shape index: {}]   ;;  %s5164_s1 = inlined_call_operand.vmem [shape: f32[56,2], index: 1, kind: input, shape index: {}]   ;;  %s5165_s0 = inlined_call_operand.vmem [shape: f32[28,4], index: 0, kind: input, shape index: {}]   ;;  %s5166_s3 = inlined_call_operand.vmem [shape: s32[8,2], index: 3, kind: input, shape index: {}]   ;;  %s5167_s5 = inlined_call_operand.vmem [shape: f32[8,2], index: 5, kind: output, shape index: {}]  }
   0x1   :  { %3544 = vset.pattern.permute.xlu0 %v5182_v0  ;;  %v3761_v1 = vld [vmem:[%s5162_s2] sm:$0xff]  ;;  %3545 = vset.pattern.permute.xlu1 %v5182_v0  ;;  %v3767_v2 = vld [vmem:[%s5162_s2 + $0x10] sm:$0xff]  ;;  %v3773_v3 = vld [vmem:[%s5162_s2 + $0x8] sm:$0xff]  ;;  %vm3702_vm2 = vmmov 0   ;;  %v5170_v8 = vmov 0.0|0.0   ;;  %vm287_vm3 = vcmask 1043456   ;;  %v20_v35 = vlaneseq }
   0x2   :  { %30 = vperm.xlu0 %3544, %v3761_v1   ;;  %36 = vperm.xlu1 %3545, %v3767_v2   ;;  %v3779_v4 = vld [vmem:[%s5162_s2 + $0x18] sm:$0xff]  ;;  %v124_v6 = vld [vmem:[%s5163_s4] sm:$0x3]  ;;  %v3799_v9 = vld [vmem:[%s5164_s1 + $0x8] sm:$0xff]  ;;  %vm3704_vm4 = vmmov 1   ;;  %v5192_v19 = vmov 0 }
   0x3   :  { %3217 = vmatprep.subr.mxu0 %v5168_v5  ;;  %3219 = vmatprep.mubr.msk.f32.mxu0 %vm3702_vm2, %v5168_v5  ;;  %v3790_v7 = vld [vmem:[%s5164_s1] sm:$0xff]  ;;  %v3813_v11 = vld [vmem:[%s5165_s0 + $0x8] sm:$0xff]  ;;  %v3818_v12 = vld [vmem:[%s5165_s0 + $0x10] sm:$0xff]  ;;  %vm394_vm6 = vcmask 1044480   ;;  %v5174_v34 = vmov 1   ;;  %v3923_v36 = vand.u32 127, %v20_v35 }
   0x4   :  { %3218 = vmatpush3.msk.msra.mxu0 %vm154_vm0, %v124_v6  ;;  %3440 = vmatprep.subr.bf16.mxu1 %v5170_v8  ;;  %v3808_v10 = vld [vmem:[%s5165_s0] sm:$0xff]  ;;  %v3828_v14 = vld [vmem:[%s5162_s2 + $0x28] sm:$0xff]  ;;  %v3837_v16 = vld [vmem:[%s5165_s0 + $0x18] sm:$0xf]  ;;  %v3706_v37 = vmov 3   ;;  %vm265_vm7 = vcmask 228352  }
   0x5   :  { %3220 = vmatmul.mubr.msk.f32.vlgmr.msra.gmra.mrb[0].mxu0 %vm132_vm1, %v3790_v7  ;;  %3248 = vmatprep.mubr.msk.f32.mxu1 %vm3702_vm2, %v5168_v5  ;;  %v3823_v13 = vld [vmem:[%s5162_s2 + $0x20] sm:$0xff]  ;;  %v3441_v15 = vpack.c.bf16 %v3813_v11, %v3808_v10  ;;  %v3444_v17 = vpack.c.bf16 %v3837_v16, %v3818_v12  ;;  %v3849_v18 = vld [vmem:[%s5164_s1 + $0x10] sm:$0xff]  ;;  %vm3852_vm5 = vmpackc.low %vm287_vm3, %vm3704_vm4  ;;  %5195 = vst [vmem:[#allocation3_spill] sm:$0xff] %v3923_v36  ;;  %vm402_vm15 = vcmask 130048   ;;  %vm778_vm4 = vcmask 31744   ;;  %s3710_s17 = smov 80  }
   0x6   :  { %33 = vperm.xlu0 %3544, %v3773_v3   ;;  %39 = vperm.xlu1 %3545, %v3779_v4   ;;  %v5193_v19 = vsel %vm3852_vm5, 4294967295, %v5192_v19  ;;  %v3859_v20 = vld [vmem:[%s5162_s2 + $0x30] sm:$0xff]  ;;  %v3874_v21 = vld [vmem:[%s5164_s1 + $0x18] sm:$0xff]  ;;  %v3883_v22 = vld [vmem:[%s5164_s1 + $0x20] sm:$0xff]  ;;  %s3723_s19 = smov 64   ;;  %s3724_s20 = smov 48  }
   0x7   :  { %3222 = vmatprep.mubr.msk.f32.mxu0 %vm3702_vm2, %v5168_v5  ;;  %3447 = vmatprep.subr.bf16.mxu0 %v5170_v8  ;;  %5194 = vst [vmem:[#allocation2_spill] sm:$0xff] %v5193_v19  ;;  %v3892_v23 = vld [vmem:[%s5164_s1 + $0x28] sm:$0xff]  ;;  %v3901_v24 = vld [vmem:[%s5164_s1 + $0x30] sm:$0xff]  ;;  %v126_v25 = vld [vmem:[%s5163_s4] sm:$0xf8]  ;;  %s3725_s0 = smov 32  }
   0x8   :  { %3442 = vmatpush3.bf16.msra.mxu1 %v3441_v15  ;;  %v127_v26 = vld [vmem:[%s5163_s4 + $0x10] sm:$0xff]  ;;  %v128_v27 = vld [vmem:[%s5163_s4 + $0x20] sm:$0x7]  ;;  %v395_v28 = vrot.slane %v126_v25, 3  ;;  %s3726_s21 = smov 16  }
   0x9   :  { %3223 = vmatmul.mubr.msk.f32.gmra.mrb[2].mxu0 %vm132_vm1, %v3799_v9  ;;  %3443 = vmatprep.subr.bf16.mxu1 %v5170_v8  ;;  %v396_v29 = vrot.slane %v127_v26, 3  ;;  %v398_v30 = vrot.slane %v128_v27, 3  ;;  %v125_v52 = vld [vmem:[%s5163_s4 + $0x2] ss:$0 sm:$0xff] }
   0xa   :  { %42 = vperm.xlu0 %3544, %v3823_v13   ;;  %45 = vperm.xlu1 %3545, %v3828_v14  }
   0xb   :  { %3225 = vmatprep.mubr.msk.f32.mxu0 %vm3702_vm2, %v5168_v5  ;;  %v397_v31 = vsel %vm394_vm6, %v395_v28, %v396_v29  ;;  %v399_v32 = vsel %vm394_vm6, %v396_v29, %v398_v30 }
   0xc   :  { %3446 = vmatpush3.bf16.msk.msra.mxu1 %vm3852_vm5, %v3444_v17  ;;  %v3448_v33 = vpack.c.bf16 %v399_v32, %v397_v31 }
   0xd   :  { %3226 = vmatmul.mubr.msk.f32.gmra.mrb[4].mxu0 %vm132_vm1, %v3849_v18 }
   0xe   :  { %48 = vperm.xlu0 %3544, %v3859_v20   ;;  %3228 = vmatprep.mubr.msk.f32.mxu0 %vm3702_vm2, %v5168_v5 }
   0xf   :  { %3449 = vmatpush3.bf16.msra.mxu0 %v3448_v33  ;;  %3547 = vset.pattern.permute.xlu1 %v5174_v34 }
  0x10   :  { %3322 = vmatprep.subr.mxu0 %v5168_v5  ;;  %75 = vperm.xlu1 %3547, %v3773_v3  }
  0x11   :  { %3229 = vmatmul.mubr.msk.f32.gmra.mrb[6].mxu0 %vm132_vm1, %v3874_v21 }
  0x12   :  { %3231 = vmatprep.mubr.msk.f32.mxu0 %vm3702_vm2, %v5168_v5  ;;  %3546 = vset.pattern.permute.xlu0 %v5174_v34 }
  0x13   :  { %72 = vperm.xlu0 %3546, %v3761_v1  }
  0x15   :  { %3232 = vmatmul.mubr.msk.f32.gmra.mrb[8].mxu0 %vm132_vm1, %v3883_v22 }
  0x16   :  { %3234 = vmatprep.mubr.msk.f32.mxu0 %vm3702_vm2, %v5168_v5 }
  0x17   :  { %78 = vperm.xlu0 %3546, %v3767_v2  }
  0x19   :  { %3235 = vmatmul.mubr.msk.f32.gmra.mrb[10].mxu0 %vm132_vm1, %v3892_v23 }
  0x1a   :  { %3237 = vmatprep.mubr.msk.f32.mxu0 %vm3702_vm2, %v5168_v5 }
  0x1b   :  { %3549 = vset.pattern.permute.xlu0 %v3706_v37 }
  0x1d   :  { %3238 = vmatmul.mubr.msk.f32.gmra.mrb[12].mxu0 %vm132_vm1, %v3901_v24 }
  0x1e   :  { %3273 = vmatprep.mubr.msk.f32.mxu0 %vm3702_vm2, %v5168_v5 }
  0x81   :  { %v31_v38 = vpop.permute.xlu0 %30  ;;  %v37_v39 = vpop.permute.xlu1 %36 }
  0x82   :  { %vm50_vm8 = vcmp.eq.s32.totalorder %v31_v38, %v3923_v36  ;;  %vm52_vm10 = vcmp.eq.s32.totalorder %v37_v39, %v3923_v36 }
  0x83   :  { %v3928_v40 = vsel %vm50_vm8, 1.0, %v5168_v5  ;;  %v3942_v44 = vsel %vm52_vm10, 1.0, %v5168_v5 }
  0x84   :  { %3249 = vmatmul.mubr.msk.f32.vlgmr.msra.gmra.mrb[0].mxu1 %vm265_vm7, %v3928_v40 }
  0x85   :  { %v34_v41 = vpop.permute.xlu0 %33  ;;  %3251 = vmatprep.mubr.msk.f32.mxu1 %vm3702_vm2, %v5168_v5  ;;  %v40_v43 = vpop.permute.xlu1 %39 }
  0x86   :  { %vm51_vm9 = vcmp.eq.s32.totalorder %v34_v41, %v3923_v36  ;;  %vm53_vm11 = vcmp.eq.s32.totalorder %v40_v43, %v3923_v36 }
  0x87   :  { %v3937_v42 = vsel %vm51_vm9, 1.0, %v5168_v5  ;;  %v3950_v46 = vsel %vm53_vm11, 1.0, %v5168_v5 }
  0x88   :  { %3252 = vmatmul.mubr.msk.f32.gmra.mrb[2].mxu1 %vm265_vm7, %v3937_v42 }
  0x89   :  { %3254 = vmatprep.mubr.msk.f32.mxu1 %vm3702_vm2, %v5168_v5  ;;  %v43_v45 = vpop.permute.xlu0 %42  ;;  %v46_v47 = vpop.permute.xlu1 %45 }
  0x8a   :  { %vm54_vm12 = vcmp.eq.s32.totalorder %v43_v45, %v3923_v36  ;;  %vm55_vm13 = vcmp.eq.s32.totalorder %v46_v47, %v3923_v36  ;;  %v5180_v47 = vmov 2  }
  0x8b   :  { %v3961_v48 = vsel %vm54_vm12, 1.0, %v5168_v5  ;;  %v3966_v50 = vsel %vm55_vm13, 1.0, %v5168_v5 }
  0x8c   :  { %3255 = vmatmul.mubr.msk.f32.gmra.mrb[4].mxu1 %vm265_vm7, %v3942_v44 }
  0x8d   :  { %3257 = vmatprep.mubr.msk.f32.mxu1 %vm3702_vm2, %v5168_v5  ;;  %v49_v49 = vpop.permute.xlu0 %48 }
  0x8e   :  { %vm56_vm14 = vcmp.eq.s32.totalorder %v49_v49, %v3923_v36 }
  0x8f   :  { %v3976_v51 = vsel %vm56_vm14, 1.0, %v5168_v5  ;;  %vm909_vm14 = vcmask 457728  }
  0x90   :  { %3258 = vmatmul.mubr.msk.f32.gmra.mrb[6].mxu1 %vm265_vm7, %v3950_v46 }
  0x91   :  { %3260 = vmatprep.mubr.msk.f32.mxu1 %vm3702_vm2, %v5168_v5 }
  0x94   :  { %3261 = vmatmul.mubr.msk.f32.gmra.mrb[8].mxu1 %vm265_vm7, %v3961_v48 }
  0x95   :  { %3263 = vmatprep.mubr.msk.f32.mxu1 %vm3702_vm2, %v5168_v5 }
  0x98   :  { %3264 = vmatmul.mubr.msk.f32.gmra.mrb[10].mxu1 %vm265_vm7, %v3966_v50 }
  0x99   :  { %3266 = vmatprep.mubr.msk.f32.mxu1 %vm3702_vm2, %v5168_v5 }
  0x9c   :  { %3267 = vmatmul.mubr.msk.f32.gmra.mrb[12].mxu1 %vm265_vm7, %v3976_v51 }
  0x9d   :  { %3296 = vmatprep.mubr.msk.f32.mxu1 %vm778_vm4, %v3808_v10 }
  0xd8   :  { %v224_v53 = vpop.f32.mrb[0].mxu0 }
  0xd9   :  { %v225_v54 = vadd.f32 %v224_v53, %v125_v52  ;;  %v3221_v55 = vpop.f32.mrb[1].mxu0 }
  0xdb   :  { %v258_v56 = vmax.f32 %v225_v54, 0.0 }
  0xdc   :  { %v229_v57 = vpop.f32.mrb[2].mxu0 }
  0xdd   :  { %v230_v58 = vadd.f32 %v229_v57, %v125_v52  ;;  %3274 = vmatmul.mubr.msk.f32.vlgmr.msra.gmra.mrb[14].mxu0 %vm402_vm15, %v258_v56  ;;  %v3224_v59 = vpop.f32.mrb[3].mxu0 }
  0xde   :  { %3276 = vmatprep.mubr.msk.f32.mxu0 %vm3702_vm2, %v5168_v5 }
  0xdf   :  { %v259_v60 = vmax.f32 %v230_v58, 0.0 }
  0xe0   :  { %v234_v61 = vpop.f32.mrb[4].mxu0 }
  0xe1   :  { %3277 = vmatmul.mubr.msk.f32.gmra.mrb[16].mxu0 %vm402_vm15, %v259_v60  ;;  %v235_v62 = vadd.f32 %v234_v61, %v125_v52  ;;  %v3227_v63 = vpop.f32.mrb[5].mxu0 }
  0xe2   :  { %3279 = vmatprep.mubr.msk.f32.mxu0 %vm3702_vm2, %v5168_v5 }
  0xe3   :  { %v260_v1 = vmax.f32 %v235_v62, 0.0 }
  0xe4   :  { %v239_v2 = vpop.f32.mrb[6].mxu0 }
  0xe5   :  { %v240_v3 = vadd.f32 %v239_v2, %v125_v52  ;;  %3280 = vmatmul.mubr.msk.f32.gmra.mrb[18].mxu0 %vm402_vm15, %v260_v1  ;;  %v3230_v6 = vpop.f32.mrb[7].mxu0 }
  0xe6   :  { %3282 = vmatprep.mubr.msk.f32.mxu0 %vm3702_vm2, %v5168_v5 }
  0xe7   :  { %v261_v15 = vmax.f32 %v240_v3, 0.0 }
  0xe8   :  { %v244_v17 = vpop.f32.mrb[8].mxu0 }
  0xe9   :  { %v245_v25 = vadd.f32 %v244_v17, %v125_v52  ;;  %3283 = vmatmul.mubr.msk.f32.gmra.mrb[20].mxu0 %vm402_vm15, %v261_v15  ;;  %v3233_v26 = vpop.f32.mrb[9].mxu0 }
  0xea   :  { %3285 = vmatprep.mubr.msk.f32.mxu0 %vm3702_vm2, %v5168_v5 }
  0xeb   :  { %v262_v27 = vmax.f32 %v245_v25, 0.0 }
  0xec   :  { %v249_v28 = vpop.f32.mrb[10].mxu0 }
  0xed   :  { %v250_v29 = vadd.f32 %v249_v28, %v125_v52  ;;  %3286 = vmatmul.mubr.msk.f32.gmra.mrb[22].mxu0 %vm402_vm15, %v262_v27  ;;  %v3236_v30 = vpop.f32.mrb[11].mxu0  ;;  %v4032_v27 = vpop.permute.xlu0 %72 }
  0xee   :  { %3288 = vmatprep.mubr.msk.f32.mxu0 %vm3702_vm2, %v5168_v5  ;;  %v4034_v28 = vpop.permute.xlu1 %75  ;;  %v4041_v30 = vld [vmem:[%s5163_s4 + $0x23] ss:$0 sm:$0xff]  ;;  %vm92_vm6 = vcmp.eq.s32.totalorder %v4032_v27, %v3923_v36 }
  0xef   :  { %v263_v31 = vmax.f32 %v250_v29, 0.0  ;;  %vm93_vm8 = vcmp.eq.s32.totalorder %v4034_v28, %v3923_v36 }
  0xf0   :  { %v254_v32 = vpop.f32.mrb[12].mxu0 }
  0xf1   :  { %v255_v33 = vadd.f32 %v254_v32, %v125_v52  ;;  %3289 = vmatmul.mubr.msk.f32.gmra.mrb[24].mxu0 %vm402_vm15, %v263_v31  ;;  %v3239_v38 = vpop.f32.mrb[13].mxu0  ;;  %v4036_v29 = vpop.permute.xlu0 %78 }
  0xf2   :  { %3291 = vmatprep.mubr.msk.f32.mxu0 %vm3702_vm2, %v5168_v5  ;;  %vm94_vm9 = vcmp.eq.s32.totalorder %v4036_v29, %v3923_v36  ;;  %v1027_v29 = vld [vmem:[%s5163_s4 + $0x30] sm:$0x6] }
  0xf3   :  { %v264_v39 = vmax.f32 %v255_v33, 0.0 }
  0xf5   :  { %3292 = vmatmul.mubr.msk.f32.gmra.mrb[26].mxu0 %vm402_vm15, %v264_v39 }
  0xf6   :  { %3324 = vmatprep.mubr.msk.f32.mxu0 %vm3702_vm2, %v5168_v5 }
 0x157   :  { %v357_v41 = vpop.f32.mrb[0].mxu1 }
 0x158   :  { %707 = vperm.xlu0 %3549, %v357_v41   ;;  %567 = vperm.xlu1 %3547, %v357_v41   ;;  %v3250_v43 = vpop.f32.mrb[1].mxu1 }
 0x15b   :  { %v362_v45 = vpop.f32.mrb[2].mxu1 }
 0x15c   :  { %3550 = vset.pattern.permute.xlu0 %v5174_v34  ;;  %3548 = vset.pattern.permute.xlu1 %v5180_v47  ;;  %v3253_v49 = vpop.f32.mrb[3].mxu1 }
 0x15d   :  { %637 = vperm.xlu1 %3548, %v357_v41   ;;  %571 = vperm.xlu0 %3550, %v362_v45  }
 0x15f   :  { %v367_v52 = vpop.f32.mrb[4].mxu1 }
 0x160   :  { %v3256_v53 = vpop.f32.mrb[5].mxu1 }
 0x161   :  { %641 = vperm.xlu1 %3548, %v362_v45   ;;  %575 = vperm.xlu0 %3550, %v367_v52  }
 0x163   :  { %v372_v54 = vpop.f32.mrb[6].mxu1 }
 0x164   :  { %v3259_v55 = vpop.f32.mrb[7].mxu1 }
 0x165   :  { %3551 = vset.pattern.permute.xlu1 %v3706_v37  ;;  %3553 = vset.pattern.permute.xlu0 %v3706_v37 }
 0x166   :  { %711 = vperm.xlu1 %3551, %v362_v45   ;;  %715 = vperm.xlu0 %3553, %v367_v52  }
 0x167   :  { %v377_v56 = vpop.f32.mrb[8].mxu1 }
 0x168   :  { %v3262_v57 = vpop.f32.mrb[9].mxu1 }
 0x16a   :  { %3552 = vset.pattern.permute.xlu1 %v5180_v47  ;;  %3555 = vset.pattern.permute.xlu0 %v5180_v47 }
 0x16b   :  { %645 = vperm.xlu1 %3552, %v367_v52   ;;  %649 = vperm.xlu0 %3555, %v372_v54   ;;  %v382_v58 = vpop.f32.mrb[10].mxu1 }
 0x16c   :  { %v3265_v59 = vpop.f32.mrb[11].mxu1 }
 0x16f   :  { %3554 = vset.pattern.permute.xlu1 %v5174_v34  ;;  %657 = vperm.xlu0 %3555, %v382_v58   ;;  %v387_v60 = vpop.f32.mrb[12].mxu1 }
 0x170   :  { %579 = vperm.xlu1 %3554, %v372_v54   ;;  %v3268_v61 = vpop.f32.mrb[13].mxu1 }
 0x173   :  { %3562 = vset.pattern.permute.xlu0 %v5174_v34 }
 0x174   :  { %3556 = vset.pattern.permute.xlu1 %v3706_v37  ;;  %591 = vperm.xlu0 %3562, %v387_v60  }
 0x175   :  { %719 = vperm.xlu1 %3556, %v372_v54  }
 0x178   :  { %84 = vperm.xlu0 %3562, %v3823_v13  }
 0x179   :  { %3557 = vset.pattern.permute.xlu1 %v5174_v34 }
 0x17a   :  { %583 = vperm.xlu1 %3557, %v377_v56  }
 0x17c   :  { %90 = vperm.xlu0 %3562, %v3859_v20  }
 0x17e   :  { %3558 = vset.pattern.permute.xlu1 %v5180_v47 }
 0x17f   :  { %653 = vperm.xlu1 %3558, %v377_v56  }
 0x180   :  { %3567 = vset.pattern.permute.xlu0 %v5182_v0 }
 0x181   :  { %531 = vperm.xlu0 %3567, %v362_v45  }
 0x183   :  { %3559 = vset.pattern.permute.xlu1 %v3706_v37 }
 0x184   :  { %723 = vperm.xlu1 %3559, %v377_v56  }
 0x185   :  { %546 = vperm.xlu0 %3567, %v377_v56  }
 0x188   :  { %3560 = vset.pattern.permute.xlu1 %v5174_v34 }
 0x189   :  { %587 = vperm.xlu1 %3560, %v382_v58   ;;  %556 = vperm.xlu0 %3567, %v387_v60  }
 0x18d   :  { %3561 = vset.pattern.permute.xlu1 %v3706_v37 }
 0x18e   :  { %727 = vperm.xlu1 %3561, %v382_v58  }
 0x192   :  { %3563 = vset.pattern.permute.xlu1 %v5180_v47 }
 0x193   :  { %661 = vperm.xlu1 %3563, %v387_v60  }
 0x197   :  { %3564 = vset.pattern.permute.xlu1 %v3706_v37 }
 0x198   :  { %731 = vperm.xlu1 %3564, %v387_v60  }
 0x19c   :  { %3565 = vset.pattern.permute.xlu1 %v5174_v34 }
 0x19d   :  { %81 = vperm.xlu1 %3565, %v3779_v4  }
 0x1a1   :  { %87 = vperm.xlu1 %3565, %v3828_v14  }
 0x1a5   :  { %3566 = vset.pattern.permute.xlu1 %v5182_v0 }
 0x1a6   :  { %526 = vperm.xlu1 %3566, %v357_v41   ;;  %v130_v41 = vld [vmem:[%s5163_s4 + $0x20] sm:$0xf0] }
 0x1a7   :  { %v777_v43 = vrot.slane %v130_v41, 4 }
 0x1a9   :  { %3294 = vmatprep.subr.msk.mxu1 %vm287_vm3, %v777_v43 }
 0x1aa   :  { %536 = vperm.xlu1 %3566, %v367_v52   ;;  %3295 = vmatpush3.msk.msra.mxu1 %vm287_vm3, %v777_v43 }
 0x1ab   :  { %3297 = vmatmul.mubr.msk.f32.vlgmr.msra.gmra.mrb[14].mxu1 %vm778_vm4, %v3813_v11 }
 0x1ac   :  { %3299 = vmatprep.mubr.msk.f32.mxu1 %vm778_vm4, %v3818_v12 }
 0x1ae   :  { %541 = vperm.xlu1 %3566, %v372_v54  }
 0x1af   :  { %3300 = vmatmul.mubr.msk.f32.gmra.mrb[16].mxu1 %vm778_vm4, %v3837_v16 }
 0x1b0   :  { %v490_v13 = vpop.f32.mrb[14].mxu0 }
 0x1b1   :  { %v3275_v20 = vpop.f32.mrb[15].mxu0  ;;  %v4044_v31 = vadd.f32 %v490_v13, %v4041_v30 }
 0x1b2   :  { %551 = vperm.xlu1 %3566, %v382_v58  }
 0x1b4   :  { %v495_v62 = vpop.f32.mrb[16].mxu0 }
 0x1b5   :  { %v3278_v63 = vpop.f32.mrb[17].mxu0  ;;  %v4048_v39 = vadd.f32 %v495_v62, %v4041_v30 }
 0x1b6   :  { %3568 = vset.pattern.permute.xlu1 %v5174_v34 }
 0x1b8   :  { %v500_v1 = vpop.f32.mrb[18].mxu0 }
 0x1b9   :  { %v3281_v2 = vpop.f32.mrb[19].mxu0  ;;  %v4063_v54 = vadd.f32 %v500_v1, %v4041_v30 }
 0x1bc   :  { %v505_v3 = vpop.f32.mrb[20].mxu0 }
 0x1bd   :  { %v3284_v6 = vpop.f32.mrb[21].mxu0  ;;  %v4079_v61 = vadd.f32 %v505_v3, %v4041_v30 }
 0x1c0   :  { %v510_v15 = vpop.f32.mrb[22].mxu0 }
 0x1c1   :  { %v3287_v4 = vpop.f32.mrb[23].mxu0  ;;  %v4092_v6 = vadd.f32 %v510_v15, %v4041_v30 }
 0x1c4   :  { %v4028_v17 = vpop.f32.mrb[24].mxu0 }
 0x1c5   :  { %v3290_v14 = vpop.f32.mrb[25].mxu0 }
 0x1c8   :  { %v4030_v25 = vpop.f32.mrb[26].mxu0 }
 0x1c9   :  { %v3293_v26 = vpop.f32.mrb[27].mxu0  ;;  %v4101_v41 = vadd.f32 %v4030_v25, %v4041_v30 }
 0x1d7   :  { %v708_v32 = vpop.permute.xlu0 %707  ;;  %v568_v33 = vpop.permute.xlu1 %567 }
 0x1d8   :  { %v594_v38 = vmul.f32 %v568_v33, %v4044_v31  ;;  %v734_v57 = vmul.f32 %v708_v32, %v4044_v31 }
 0x1da   :  { %608 = vrot.lane.b32.xlu0 %v594_v38, %s3708_s13 }
 0x1dc   :  { %v638_v45 = vpop.permute.xlu1 %637  ;;  %v572_v49 = vpop.permute.xlu0 %571 }
 0x1dd   :  { %v664_v52 = vmul.f32 %v638_v45, %v4044_v31  ;;  %v595_v53 = vmul.f32 %v572_v49, %v4048_v39  ;;  %v4107_v45 = vadd.f32 %v4028_v17, %v4041_v30 }
 0x1df   :  { %610 = vrot.lane.b32.xlu1 %v595_v53, %s3708_s13  ;;  %678 = vrot.lane.b32.xlu0 %v664_v52, %s3709_s16 }
 0x1e0   :  { %v642_v55 = vpop.permute.xlu1 %641  ;;  %v576_v56 = vpop.permute.xlu0 %575 }
 0x1e1   :  { %v665_v58 = vmul.f32 %v642_v55, %v4048_v39  ;;  %v596_v10 = vmul.f32 %v576_v56, %v4063_v54 }
 0x1e3   :  { %680 = vrot.lane.b32.xlu1 %v665_v58, %s3709_s16  ;;  %748 = vrot.lane.b32.xlu0 %v734_v57, %s3710_s17 }
 0x1e5   :  { %v712_v59 = vpop.permute.xlu1 %711  ;;  %v716_v60 = vpop.permute.xlu0 %715 }
 0x1e6   :  { %v735_v11 = vmul.f32 %v712_v59, %v4048_v39  ;;  %v736_v16 = vmul.f32 %v716_v60, %v4063_v54  ;;  %v3042_v60 = vsel %vm92_vm6, 1.0, %v5168_v5 }
 0x1e7   :  { %612 = vrot.lane.b32.xlu0 %v596_v10, %s3708_s13 }
 0x1e8   :  { %750 = vrot.lane.b32.xlu1 %v735_v11, %s3710_s17 }
 0x1ea   :  { %v646_v12 = vpop.permute.xlu1 %645  ;;  %v650_v13 = vpop.permute.xlu0 %649 }
 0x1eb   :  { %v666_v20 = vmul.f32 %v646_v12, %v4063_v54  ;;  %v667_v62 = vmul.f32 %v650_v13, %v4079_v61  ;;  %v3043_v13 = vsel %vm93_vm8, 1.0, %v5168_v5 }
 0x1ed   :  { %682 = vrot.lane.b32.xlu1 %v666_v20, %s3709_s16  ;;  %684 = vrot.lane.b32.xlu0 %v667_v62, %s3709_s16  ;;  %v3044_v62 = vsel %vm94_vm9, 1.0, %v5168_v5 }
 0x1ee   :  { %v658_v32 = vpop.permute.xlu0 %657 }
 0x1ef   :  { %v580_v63 = vpop.permute.xlu1 %579  ;;  %v669_v25 = vmul.f32 %v658_v32, %v4107_v45 }
 0x1f0   :  { %v597_v1 = vmul.f32 %v580_v63, %v4079_v61 }
 0x1f1   :  { %752 = vrot.lane.b32.xlu1 %v736_v16, %s3710_s17 }
 0x1f3   :  { %v592_v43 = vpop.permute.xlu0 %591 }
 0x1f4   :  { %v720_v2 = vpop.permute.xlu1 %719  ;;  %v600_v49 = vmul.f32 %v592_v43, %v4101_v41 }
 0x1f5   :  { %v737_v3 = vmul.f32 %v720_v2, %v4079_v61  ;;  %614 = vrot.lane.b32.xlu1 %v597_v1, %s3708_s13  ;;  %v1042_v1 = vrot.slane %v1027_v29, 1 }
 0x1f7   :  { %754 = vrot.lane.b32.xlu0 %v737_v3, %s3710_s17  ;;  %v85_v59 = vpop.permute.xlu0 %84  ;;  %3323 = vmatpush3.msk.msra.mxu0 %vm154_vm0, %v1042_v1 }
 0x1f8   :  { %vm96_vm11 = vcmp.eq.s32.totalorder %v85_v59, %v3923_v36  ;;  %3325 = vmatmul.mubr.msk.f32.vlgmr.msra.gmra.mrb[28].mxu0 %vm132_vm1, %v3790_v7 }
 0x1f9   :  { %v584_v4 = vpop.permute.xlu1 %583  ;;  %v3046_v2 = vsel %vm96_vm11, 1.0, %v5168_v5  ;;  %3327 = vmatprep.mubr.msk.f32.mxu0 %vm3702_vm2, %v5168_v5 }
 0x1fa   :  { %v598_v14 = vmul.f32 %v584_v4, %v4092_v6 }
 0x1fb   :  { %v91_v12 = vpop.permute.xlu0 %90 }
 0x1fc   :  { %616 = vrot.lane.b32.xlu1 %v598_v14, %s3708_s13  ;;  %vm98_vm13 = vcmp.eq.s32.totalorder %v91_v12, %v3923_v36  ;;  %3328 = vmatmul.mubr.msk.f32.gmra.mrb[30].mxu0 %vm132_vm1, %v3799_v9 }
 0x1fd   :  { %3330 = vmatprep.mubr.msk.f32.mxu0 %vm3702_vm2, %v5168_v5 }
 0x1fe   :  { %v654_v26 = vpop.permute.xlu1 %653 }
 0x1ff   :  { %v668_v33 = vmul.f32 %v654_v26, %v4092_v6  ;;  %v3048_v26 = vsel %vm98_vm13, 1.0, %v5168_v5 }
 0x200   :  { %v532_v27 = vpop.permute.xlu0 %531  ;;  %3331 = vmatmul.mubr.msk.f32.gmra.mrb[32].mxu0 %vm132_vm1, %v3849_v18 }
 0x201   :  { %686 = vrot.lane.b32.xlu1 %v668_v33, %s3709_s16  ;;  %3333 = vmatprep.mubr.msk.f32.mxu0 %vm3702_vm2, %v5168_v5  ;;  %v560_v9 = vmul.f32 %v532_v27, %v4048_v39 }
 0x203   :  { %v724_v38 = vpop.permute.xlu1 %723 }
 0x204   :  { %v738_v15 = vmul.f32 %v724_v38, %v4092_v6  ;;  %v4133_v63 = vpop.permute.xlu0 %546  ;;  %3334 = vmatmul.mubr.msk.f32.gmra.mrb[34].mxu0 %vm132_vm1, %v3874_v21 }
 0x205   :  { %3336 = vmatprep.mubr.msk.f32.mxu0 %vm3702_vm2, %v5168_v5 }
 0x206   :  { %756 = vrot.lane.b32.xlu1 %v738_v15, %s3710_s17 }
 0x208   :  { %v588_v52 = vpop.permute.xlu1 %587  ;;  %v4145_v4 = vpop.permute.xlu0 %556  ;;  %3337 = vmatmul.mubr.msk.f32.gmra.mrb[36].mxu0 %vm132_vm1, %v3883_v22 }
 0x209   :  { %v599_v53 = vmul.f32 %v588_v52, %v4107_v45  ;;  %3339 = vmatprep.mubr.msk.f32.mxu0 %vm3702_vm2, %v5168_v5 }
 0x20a   :  { %620 = vrot.lane.b32.xlu1 %v600_v49, %s3708_s13 }
 0x20b   :  { %618 = vrot.lane.b32.xlu0 %v599_v53, %s3708_s13 }
 0x20c   :  { %3340 = vmatmul.mubr.msk.f32.gmra.mrb[38].mxu0 %vm132_vm1, %v3892_v23 }
 0x20d   :  { %v728_v55 = vpop.permute.xlu1 %727  ;;  %3342 = vmatprep.mubr.msk.f32.mxu0 %vm3702_vm2, %v5168_v5 }
 0x20e   :  { %v739_v56 = vmul.f32 %v728_v55, %v4107_v45 }
 0x20f   :  { %688 = vrot.lane.b32.xlu0 %v669_v25, %s3709_s16 }
 0x210   :  { %3343 = vmatmul.mubr.msk.f32.gmra.mrb[40].mxu0 %vm132_vm1, %v3901_v24 }
 0x211   :  { %1371 = vmatprep.mubr.f32.mxu0 %v5168_v5 }
 0x212   :  { %v662_v57 = vpop.permute.xlu1 %661 }
 0x213   :  { %758 = vrot.lane.b32.xlu0 %v739_v56, %s3710_s17  ;;  %v670_v17 = vmul.f32 %v662_v57, %v4101_v41 }
 0x217   :  { %v732_v30 = vpop.permute.xlu1 %731  ;;  %690 = vrot.lane.b32.xlu0 %v670_v17, %s3709_s16 }
 0x218   :  { %v740_v58 = vmul.f32 %v732_v30, %v4101_v41 }
 0x21a   :  { %760 = vrot.lane.b32.xlu1 %v740_v58, %s3710_s17 }
 0x21c   :  { %v82_v10 = vpop.permute.xlu1 %81 }
 0x21d   :  { %vm95_vm10 = vcmp.eq.s32.totalorder %v82_v10, %v3923_v36 }
 0x21e   :  { %v3045_v16 = vsel %vm95_vm10, 1.0, %v5168_v5 }
 0x220   :  { %v88_v11 = vpop.permute.xlu1 %87 }
 0x221   :  { %vm97_vm12 = vcmp.eq.s32.totalorder %v88_v11, %v3923_v36  ;;  %v5207_v36 = vmov 6  }
 0x222   :  { %v3047_v14 = vsel %vm97_vm12, 1.0, %v5168_v5 }
 0x225   :  { %v527_v20 = vpop.permute.xlu1 %526 }
 0x226   :  { %v559_v15 = vmul.f32 %v527_v20, %v4044_v31 }
 0x229   :  { %v537_v28 = vpop.permute.xlu1 %536 }
 0x22a   :  { %v561_v17 = vmul.f32 %v537_v28, %v4063_v54  ;;  %v563_v54 = vmul.f32 %v4133_v63, %v4092_v6 }
 0x22d   :  { %v542_v3 = vpop.permute.xlu1 %541 }
 0x22e   :  { %v562_v23 = vmul.f32 %v542_v3, %v4079_v61 }
 0x231   :  { %v552_v32 = vpop.permute.xlu1 %551 }
 0x232   :  { %v564_v61 = vmul.f32 %v552_v32, %v4107_v45 }
 0x235   :  { %877 = vxpose.xlu0.b32.start [1/7] (short) (narrow) %v3042_v60, 32 }
 0x239   :  { %878 = vxpose.xlu0.b32.cont [2/7] (short) (narrow) %v3043_v13, 32 }
 0x23d   :  { %879 = vxpose.xlu0.b32.cont [3/7] (short) (narrow) %v3044_v62, 32 }
 0x241   :  { %880 = vxpose.xlu0.b32.cont [4/7] (short) (narrow) %v3045_v16, 32 }
 0x245   :  { %881 = vxpose.xlu0.b32.cont [5/7] (short) (narrow) %v3046_v2, 32 }
 0x249   :  { %882 = vxpose.xlu0.b32.cont [6/7] (short) (narrow) %v3047_v14, 32 }
 0x24c   :  { %v609_v7 = vpop.permute.xlu0 %608 }
 0x24d   :  { %883 = vxpose.xlu0.b32.end [7/7] (short) (narrow) %v3048_v26, 32  ;;  %v629_v18 = vadd.f32 %v609_v7, %v559_v15 }
 0x251   :  { %v611_v33 = vpop.permute.xlu1 %610  ;;  %v679_v38 = vpop.permute.xlu0 %678 }
 0x252   :  { %v630_v49 = vadd.f32 %v611_v33, %v560_v9  ;;  %v699_v53 = vadd.f32 %v679_v38, %v629_v18  ;;  %v565_v33 = vmul.f32 %v4145_v4, %v4101_v41 }
 0x255   :  { %v681_v43 = vpop.permute.xlu1 %680  ;;  %v749_v52 = vpop.permute.xlu0 %748 }
 0x256   :  { %v700_v25 = vadd.f32 %v681_v43, %v630_v49  ;;  %v769_v55 = vadd.f32 %v749_v52, %v699_v53  ;;  %v4204_v52 = vld [vmem:[%s5163_s4 + $0x33] ss:$0 sm:$0xff] }
 0x259   :  { %v613_v56 = vpop.permute.xlu0 %612 }
 0x25a   :  { %v751_v21 = vpop.permute.xlu1 %750  ;;  %v631_v10 = vadd.f32 %v613_v56, %v561_v17  ;;  %v1033_v17 = vld [vmem:[%s5163_s4 + $0x50] sm:$0xf] }
 0x25b   :  { %v770_v39 = vadd.f32 %v751_v21, %v700_v25  ;;  %v1030_v25 = vld [vmem:[%s5163_s4 + $0x38] sm:$0xf0]  ;;  %v1032_v21 = vld [vmem:[%s5163_s4 + $0x48] sm:$0xff] }
 0x25d   :  { %v3450_v31 = vpack.c.bf16 %v770_v39, %v769_v55  ;;  %v1034_v55 = vld [vmem:[%s5163_s4 + $0x58] sm:$0xf]  ;;  %v1275_v39 = vrot.slane %v1030_v25, 4 }
 0x25e   :  { %v1280_v56 = vrot.slane %v1034_v55, 4 }
 0x25f   :  { %v683_v22 = vpop.permute.xlu1 %682  ;;  %3451 = vmatprep.subr.bf16.mxu1 %v3450_v31  ;;  %v685_v30 = vpop.permute.xlu0 %684 }
 0x260   :  { %3453 = vmatpush3.bf16.msra.mxu1 %v3450_v31  ;;  %v701_v60 = vadd.f32 %v683_v22, %v631_v10  ;;  %v1276_v31 = vrot.slane %v1032_v21, 4  ;;  %v1029_v22 = vld [vmem:[%s5163_s4 + $0x30] sm:$0xf0] }
 0x262   :  { %v1277_v10 = vsel %vm287_vm3, %v1275_v39, %v1276_v31 }
 0x263   :  { %v753_v57 = vpop.permute.xlu1 %752 }
 0x264   :  { %v771_v13 = vadd.f32 %v753_v57, %v701_v60  ;;  %v1031_v57 = vld [vmem:[%s5163_s4 + $0x40] sm:$0xff]  ;;  %v1278_v60 = vrot.slane %v1033_v17, 4 }
 0x267   :  { %v615_v58 = vpop.permute.xlu1 %614 }
 0x268   :  { %v632_v59 = vadd.f32 %v615_v58, %v562_v23  ;;  %v1272_v23 = vrot.slane %v1029_v22, 4 }
 0x269   :  { %v755_v12 = vpop.permute.xlu0 %754 }
 0x26a   :  { %v702_v11 = vadd.f32 %v685_v30, %v632_v59  ;;  %v1273_v59 = vrot.slane %v1031_v57, 4 }
 0x26c   :  { %v772_v24 = vadd.f32 %v755_v12, %v702_v11  ;;  %v1281_v12 = vsel %vm287_vm3, %v1276_v31, %v1280_v56 }
 0x26e   :  { %v3454_v20 = vpack.c.bf16 %v772_v24, %v771_v13  ;;  %v617_v62 = vpop.permute.xlu1 %616  ;;  %v3469_v24 = vpack.c.bf16 %v1281_v12, %v1277_v10 }
 0x26f   :  { %v633_v1 = vadd.f32 %v617_v62, %v563_v54  ;;  %v1279_v62 = vsel %vm287_vm3, %v1273_v59, %v1278_v60  ;;  %v1038_v60 = vld [vmem:[%s5163_s4 + $0x60] sm:$0xff] }
 0x270   :  { %3455 = vmatprep.subr.bf16.mxu1 %v3454_v20  ;;  %3470 = vmatprep.subr.bf16.mxu0 %v3469_v24 }
 0x271   :  { %3457 = vmatpush3.bf16.msra.mxu1 %v3454_v20  ;;  %v1274_v20 = vsel %vm287_vm3, %v1272_v23, %v1273_v59  ;;  %v1037_v59 = vld [vmem:[%s5163_s4 + $0x50] sm:$0xe0]  ;;  %vm2481_vm3 = vcmask 1042432  }
 0x272   :  { %v2482_v24 = vrot.slane %v1037_v59, 5 }
 0x273   :  { %v687_v27 = vpop.permute.xlu1 %686 }
 0x274   :  { %v703_v3 = vadd.f32 %v687_v27, %v633_v1 }
 0x278   :  { %v757_v29 = vpop.permute.xlu1 %756 }
 0x279   :  { %v773_v38 = vadd.f32 %v757_v29, %v703_v3  ;;  %v3471_v29 = vpack.c.bf16 %v1279_v62, %v1274_v20  ;;  %v2483_v20 = vrot.slane %v1038_v60, 5  ;;  %v3719_v60 = vmov 7  }
 0x27b   :  { %3472 = vmatpush1.bf16.msra.mxu0 %v3471_v29 }
 0x27c   :  { %v621_v26 = vpop.permute.xlu1 %620  ;;  %3496 = vmatprep.subr.bf16.mxu0 %v5170_v8 }
 0x27d   :  { %v619_v16 = vpop.permute.xlu0 %618  ;;  %v635_v15 = vadd.f32 %v621_v26, %v565_v33 }
 0x27e   :  { %v634_v2 = vadd.f32 %v619_v16, %v564_v61  ;;  %v3711_v16 = vmov 10  }
 0x27f   :  { %3576 = vset.pattern.permute.xlu0 %v3711_v16 }
 0x281   :  { %v689_v28 = vpop.permute.xlu0 %688 }
 0x282   :  { %v704_v14 = vadd.f32 %v689_v28, %v634_v2 }
 0x285   :  { %v759_v7 = vpop.permute.xlu0 %758 }
 0x286   :  { %v774_v9 = vadd.f32 %v759_v7, %v704_v14 }
 0x288   :  { %v3458_v43 = vpack.c.bf16 %v774_v9, %v773_v38 }
 0x289   :  { %v691_v18 = vpop.permute.xlu0 %690 }
 0x28a   :  { %v705_v49 = vadd.f32 %v691_v18, %v635_v15  ;;  %3459 = vmatprep.subr.bf16.mxu1 %v3458_v43  ;;  %v131_v18 = vld [vmem:[%s5163_s4 + $0x30] ss:$0 sm:$0xff] }
 0x28b   :  { %3461 = vmatpush3.bf16.msra.mxu1 %v3458_v43 }
 0x28c   :  { %v761_v6 = vpop.permute.xlu1 %760 }
 0x28d   :  { %v775_v45 = vadd.f32 %v761_v6, %v705_v49 }
 0x28f   :  { %3314 = vmatprep.subr.mxu1 %v775_v45 }
 0x290   :  { %3315 = vmatpush3.msra.mxu1 %v775_v45 }
 0x291   :  { %3462 = vmatprep.subr.bf16.mxu1 %v5170_v8 }
 0x2b5   :  { %v4183_v63 = vpop.trf.xlu0 }
 0x2b6   :  { %3316 = vmatprep.mubr.msk.f32.mxu1 %vm909_vm14, %v4183_v63 }
 0x2b9   :  { %v4187_v41 = vpop.trf.xlu0 }
 0x2ba   :  { %5196 = vst [vmem:[#allocation4_spill] sm:$0xff] %v4187_v41  ;;  %3317 = vmatmul.mubr.msk.f32.vlgmr.msra.gmra.mrb[14].mxu1 %vm909_vm14, %v4187_v41  ;;  %v5209_v41 = vmov 11  }
 0x2bd   :  { %v4191_v4 = vpop.trf.xlu0 }
 0x2be   :  { %5197 = vst [vmem:[#allocation5_spill] sm:$0xff] %v4191_v4  ;;  %3319 = vmatprep.mubr.msk.f32.mxu1 %vm909_vm14, %v4191_v4 }
 0x2c1   :  { %v4195_v32 = vpop.trf.xlu0 }
 0x2c2   :  { %5198 = vst [vmem:[#allocation6_spill] sm:$0xff] %v4195_v32  ;;  %3320 = vmatmul.mubr.msk.f32.gmra.mrb[16].mxu1 %vm909_vm14, %v4195_v32  ;;  %v5208_v32 = vmov 9  }
 0x2c3   :  { %3353 = vmatprep.mubr.msk.f32.mxu1 %vm3702_vm2, %v5168_v5 }
 0x2cb   :  { %v1111_v53 = vpop.f32.mrb[28].mxu0 }
 0x2cc   :  { %v3326_v30 = vpop.f32.mrb[29].mxu0  ;;  %v1112_v58 = vadd.f32 %v1111_v53, %v4204_v52 }
 0x2ce   :  { %v1145_v61 = vmax.f32 %v1112_v58, 0.0 }
 0x2cf   :  { %v1116_v11 = vpop.f32.mrb[30].mxu0 }
 0x2d0   :  { %v3329_v13 = vpop.f32.mrb[31].mxu0  ;;  %v1117_v28 = vadd.f32 %v1116_v11, %v4204_v52  ;;  %3098 = vmatmul.mubr.msk.f32.vlgmr.msra.gmra.mrb[42].mxu0 %vm402_vm15, %v1145_v61  ;;  %v1039_v11 = vld [vmem:[%s5163_s4 + $0x70] sm:$0x1f] }
 0x2d1   :  { %1377 = vmatprep.mubr.f32.mxu0 %v5168_v5  ;;  %v2485_v62 = vrot.slane %v1039_v11, 5  ;;  %v5178_v11 = vmov 9  }
 0x2d2   :  { %v1146_v26 = vmax.f32 %v1117_v28, 0.0  ;;  %v2484_v28 = vsel %vm2481_vm3, %v2482_v24, %v2483_v20  ;;  %v5183_v24 = vmov 13  }
 0x2d3   :  { %v1121_v27 = vpop.f32.mrb[32].mxu0 }
 0x2d4   :  { %v3332_v54 = vpop.f32.mrb[33].mxu0  ;;  %v1122_v7 = vadd.f32 %v1121_v27, %v4204_v52  ;;  %3099 = vmatmul.mubr.msk.f32.gmra.mrb[44].mxu0 %vm402_vm15, %v1146_v26 }
 0x2d5   :  { %1383 = vmatprep.mubr.f32.mxu0 %v5168_v5 }
 0x2d6   :  { %v1147_v33 = vmax.f32 %v1122_v7, 0.0 }
 0x2d7   :  { %v1126_v1 = vpop.f32.mrb[34].mxu0 }
 0x2d8   :  { %v3335_v2 = vpop.f32.mrb[35].mxu0  ;;  %v1127_v38 = vadd.f32 %v1126_v1, %v4204_v52  ;;  %3100 = vmatmul.mubr.msk.f32.gmra.mrb[46].mxu0 %vm402_vm15, %v1147_v33  ;;  %v2486_v1 = vsel %vm2481_vm3, %v2483_v20, %v2485_v62 }
 0x2d9   :  { %1389 = vmatprep.mubr.f32.mxu0 %v5168_v5 }
 0x2da   :  { %v1148_v9 = vmax.f32 %v1127_v38, 0.0 }
 0x2db   :  { %v1131_v3 = vpop.f32.mrb[36].mxu0 }
 0x2dc   :  { %v3338_v14 = vpop.f32.mrb[37].mxu0  ;;  %v1132_v15 = vadd.f32 %v1131_v3, %v4204_v52  ;;  %3101 = vmatmul.mubr.msk.f32.gmra.mrb[48].mxu0 %vm402_vm15, %v1148_v9 }
 0x2dd   :  { %1395 = vmatprep.mubr.f32.mxu0 %v5168_v5  ;;  %v3473_v14 = vpack.c.bf16 %v2486_v1, %v2484_v28 }
 0x2de   :  { %v1149_v43 = vmax.f32 %v1132_v15, 0.0 }
 0x2e0   :  { %3102 = vmatmul.mubr.msk.f32.gmra.mrb[50].mxu0 %vm402_vm15, %v1149_v43 }
 0x2e1   :  { %1401 = vmatprep.mubr.f32.mxu0 %v5168_v5 }
 0x38d   :  { %v3318_v49 = vpop.f32.mrb[14].mxu1 }
 0x38e   :  { %v1008_v6 = vadd.f32 %v3318_v49, %v131_v18  ;;  %v988_v45 = vpop.f32.mrb[15].mxu1 }
 0x38f   :  { %v1007_v53 = vadd.f32 %v988_v45, %v131_v18 }
 0x390   :  { %v1012_v25 = vmul.f32 0.5, %v1008_v6 }
 0x391   :  { %v1011_v21 = vmul.f32 0.5, %v1007_v53  ;;  %v3713_v53 = vmov 14  }
 0x392   :  { %3682 = vtanh.f32 %v1012_v25 }
 0x393   :  { %3684 = vtanh.f32 %v1011_v21 }
 0x395   :  { %v3321_v55 = vpop.f32.mrb[16].mxu1 }
 0x396   :  { %v1010_v39 = vadd.f32 %v3321_v55, %v131_v18  ;;  %v998_v31 = vpop.f32.mrb[17].mxu1  ;;  %v5179_v55 = vmov 4  }
 0x397   :  { %v1009_v22 = vadd.f32 %v998_v31, %v131_v18 }
 0x398   :  { %v1014_v56 = vmul.f32 0.5, %v1010_v39  ;;  %v5184_v39 = vmov 15  }
 0x399   :  { %v1013_v57 = vmul.f32 0.5, %v1009_v22 }
 0x39a   :  { %3686 = vtanh.f32 %v1014_v56  ;;  %v3716_v56 = vmov 5  }
 0x39b   :  { %3688 = vtanh.f32 %v1013_v57 }
 0x39c   :  { %v3683_v17 = vpop.eup %3682 }
 0x39d   :  { %v3685_v23 = vpop.eup %3684  ;;  %v1020_v30 = vmul.f32 0.5, %v3683_v17 }
 0x39e   :  { %v1019_v58 = vmul.f32 0.5, %v3685_v23 }
 0x39f   :  { %v1024_v10 = vadd.f32 0.5, %v1020_v30  ;;  %v5177_v30 = vmov 6  }
 0x3a0   :  { %v1023_v12 = vadd.f32 0.5, %v1019_v58  ;;  %v5172_v58 = vmov 8  }
 0x3a2   :  { %v3463_v13 = vpack.c.bf16 %v1024_v10, %v1023_v12 }
 0x3a4   :  { %v3687_v27 = vpop.eup %3686  ;;  %3464 = vmatpush3.bf16.msra.mxu1 %v3463_v13  ;;  %v5181_v13 = vmov 11  }
 0x3a5   :  { %v3689_v29 = vpop.eup %3688  ;;  %v1022_v54 = vmul.f32 0.5, %v3687_v27  ;;  %3465 = vmatprep.subr.bf16.mxu1 %v5170_v8 }
 0x3a6   :  { %v1021_v61 = vmul.f32 0.5, %v3689_v29 }
 0x3a7   :  { %v1026_v2 = vadd.f32 0.5, %v1022_v54 }
 0x3a8   :  { %v1025_v3 = vadd.f32 0.5, %v1021_v61 }
 0x3aa   :  { %v3466_v26 = vpack.c.bf16 %v1026_v2, %v1025_v3 }
 0x3ac   :  { %3468 = vmatpush3.bf16.msk.msra.mxu1 %vm3852_vm5, %v3466_v26 }
 0x3ad   :  { %3474 = vmatprep.subr.bf16.mxu1 %v3473_v14 }
 0x3af   :  { %3354 = vmatmul.mubr.msk.f32.vlgmr.msra.gmra.mrb[18].mxu1 %vm265_vm7, %v3928_v40  ;;  %v1136_v40 = vpop.f32.mrb[38].mxu0 }
 0x3b0   :  { %3356 = vmatprep.mubr.msk.f32.mxu1 %vm3702_vm2, %v5168_v5  ;;  %3476 = vmatpush3.bf16.msra.mxu1 %v3473_v14  ;;  %v1257_v14 = vshrl.u32 %v20_v35, 7 }
 0x3b3   :  { %3357 = vmatmul.mubr.msk.f32.gmra.mrb[20].mxu1 %vm265_vm7, %v3937_v42  ;;  %v1137_v42 = vadd.f32 %v1136_v40, %v4204_v52 }
 0x3b4   :  { %3359 = vmatprep.mubr.msk.f32.mxu1 %vm3702_vm2, %v5168_v5 }
 0x3b7   :  { %3360 = vmatmul.mubr.msk.f32.gmra.mrb[22].mxu1 %vm265_vm7, %v3942_v44  ;;  %v3341_v44 = vpop.f32.mrb[39].mxu0 }
 0x3b8   :  { %3362 = vmatprep.mubr.msk.f32.mxu1 %vm3702_vm2, %v5168_v5  ;;  %v3081_v44 = vld [vmem:[%s5163_s4 + $0x54] ss:$8 sm:$0x3] }
 0x3bb   :  { %3363 = vmatmul.mubr.msk.f32.gmra.mrb[24].mxu1 %vm265_vm7, %v3950_v46  ;;  %v1150_v46 = vmax.f32 %v1137_v42, 0.0  ;;  %v1258_v42 = vsub.s32 0, %v1257_v14 }
 0x3bc   :  { %3365 = vmatprep.mubr.msk.f32.mxu1 %vm3702_vm2, %v5168_v5 }
 0x3bd   :  { %3103 = vmatmul.mubr.msk.f32.gmra.mrb[52].mxu0 %vm402_vm15, %v1150_v46 }
 0x3be   :  { %1407 = vmatprep.mubr.f32.mxu0 %v5168_v5 }
 0x3bf   :  { %3366 = vmatmul.mubr.msk.f32.gmra.mrb[26].mxu1 %vm265_vm7, %v3961_v48  ;;  %v1141_v48 = vpop.f32.mrb[40].mxu0 }
 0x3c0   :  { %3368 = vmatprep.mubr.msk.f32.mxu1 %vm3702_vm2, %v5168_v5 }
 0x3c3   :  { %3369 = vmatmul.mubr.msk.f32.gmra.mrb[28].mxu1 %vm265_vm7, %v3966_v50  ;;  %v1142_v50 = vadd.f32 %v1141_v48, %v4204_v52  ;;  %v5176_v52 = vmov 12   ;;  %v4463_v48 = vrot.slane %v3081_v44, %v1258_v42 }
 0x3c4   :  { %3371 = vmatprep.mubr.msk.f32.mxu1 %vm3702_vm2, %v5168_v5 }
 0x3c5   :  { %v1151_v7 = vmax.f32 %v1142_v50, 0.0 }
 0x3c7   :  { %3372 = vmatmul.mubr.msk.f32.gmra.mrb[30].mxu1 %vm265_vm7, %v3976_v51  ;;  %v3344_v51 = vpop.f32.mrb[41].mxu0  ;;  %3104 = vmatmul.mubr.msk.f32.gmra.mrb[54].mxu0 %vm402_vm15, %v1151_v7 }
 0x3c8   :  { %3378 = vmatprep.mubr.msk.f32.mxu1 %vm402_vm15, %v1023_v12  ;;  %3423 = vmatprep.mubr.msk.f32.mxu0 %vm3702_vm2, %v5168_v5 }
 0x3cb   :  { %3379 = vmatmul.mubr.msk.f32.vlgmr.msra.gmra.mrb[32].mxu1 %vm402_vm15, %v1024_v10 }
 0x3cc   :  { %3381 = vmatprep.mubr.msk.f32.mxu1 %vm402_vm15, %v1025_v3 }
 0x3cf   :  { %3382 = vmatmul.mubr.msk.f32.gmra.mrb[34].mxu1 %vm402_vm15, %v1026_v2 }
 0x3d0   :  { %3398 = vmatprep.mubr.msk.f32.mxu1 %vm909_vm14, %v4183_v63  ;;  %v4299_v63 = vpop.f32.mrb[42].mxu0 }
 0x3d1   :  { %v4301_v33 = vpop.f32.mrb[43].mxu0  ;;  %v4471_v50 = vadd.f32 %v4299_v63, %v4463_v48 }
 0x3d2   :  { %v4313_v18 = vpop.f32.mrb[44].mxu0 }
 0x3d3   :  { %v4315_v49 = vpop.f32.mrb[45].mxu0 }
 0x3d4   :  { %v4343_v59 = vpop.f32.mrb[46].mxu0 }
 0x3d5   :  { %v4353_v12 = vpop.f32.mrb[47].mxu0 }
 0x3d6   :  { %v4371_v20 = vpop.f32.mrb[48].mxu0 }
 0x3d7   :  { %v4381_v62 = vpop.f32.mrb[49].mxu0 }
 0x3d8   :  { %v4391_v27 = vpop.f32.mrb[50].mxu0 }
 0x3d9   :  { %v4401_v29 = vpop.f32.mrb[51].mxu0 }
 0x482   :  { %v4303_v38 = vpop.f32.mrb[18].mxu1 }
 0x483   :  { %2059 = vperm.xlu0 %3576, %v4303_v38   ;;  %1457 = vperm.xlu1 %3568, %v4303_v38   ;;  %v3355_v9 = vpop.f32.mrb[19].mxu1 }
 0x486   :  { %v4307_v15 = vpop.f32.mrb[20].mxu1 }
 0x487   :  { %3578 = vset.pattern.permute.xlu0 %v5176_v52  ;;  %3569 = vset.pattern.permute.xlu1 %v5180_v47  ;;  %v3358_v43 = vpop.f32.mrb[21].mxu1 }
 0x488   :  { %2199 = vperm.xlu0 %3578, %v4303_v38   ;;  %1527 = vperm.xlu1 %3569, %v4303_v38  }
 0x48a   :  { %v4317_v6 = vpop.f32.mrb[22].mxu1 }
 0x48b   :  { %v3361_v45 = vpop.f32.mrb[23].mxu1 }
 0x48c   :  { %3596 = vset.pattern.permute.xlu0 %v3713_v53  ;;  %3570 = vset.pattern.permute.xlu1 %v3706_v37 }
 0x48d   :  { %1597 = vperm.xlu1 %3570, %v4303_v38   ;;  %2343 = vperm.xlu0 %3596, %v4307_v15  }
 0x48e   :  { %v4323_v25 = vpop.f32.mrb[24].mxu1 }
 0x48f   :  { %v3364_v21 = vpop.f32.mrb[25].mxu1 }
 0x490   :  { %v4423_v54 = vpop.f32.mrb[52].mxu0 }
 0x491   :  { %3571 = vset.pattern.permute.xlu1 %v5179_v55  ;;  %3597 = vset.pattern.permute.xlu0 %v5184_v39  ;;  %v4429_v61 = vpop.f32.mrb[53].mxu0 }
 0x492   :  { %1667 = vperm.xlu1 %3571, %v4303_v38   ;;  %2413 = vperm.xlu0 %3597, %v4307_v15   ;;  %v4329_v31 = vpop.f32.mrb[26].mxu1 }
 0x493   :  { %v3367_v22 = vpop.f32.mrb[27].mxu1 }
 0x494   :  { %v1262_v22 = vsub.s32 1, %v1257_v14 }
 0x496   :  { %3572 = vset.pattern.permute.xlu1 %v3716_v56  ;;  %3598 = vset.pattern.permute.xlu0 %v5182_v0  ;;  %v4333_v57 = vpop.f32.mrb[28].mxu1 }
 0x497   :  { %1737 = vperm.xlu1 %3572, %v4303_v38   ;;  %1421 = vperm.xlu0 %3598, %v4307_v15   ;;  %v3370_v17 = vpop.f32.mrb[29].mxu1 }
 0x49a   :  { %v4337_v23 = vpop.f32.mrb[30].mxu1  ;;  %v4435_v28 = vpop.f32.mrb[54].mxu0 }
 0x49b   :  { %3573 = vset.pattern.permute.xlu1 %v5177_v30  ;;  %3599 = vset.pattern.permute.xlu0 %v5172_v58  ;;  %v3373_v10 = vpop.f32.mrb[31].mxu1  ;;  %v4454_v26 = vpop.f32.mrb[55].mxu0 }
 0x49c   :  { %1807 = vperm.xlu1 %3573, %v4303_v38   ;;  %1951 = vperm.xlu0 %3599, %v4307_v15  }
 0x4a0   :  { %3574 = vset.pattern.permute.xlu1 %v3719_v60  ;;  %3602 = vset.pattern.permute.xlu0 %v3706_v37 }
 0x4a1   :  { %1877 = vperm.xlu1 %3574, %v4303_v38   ;;  %1605 = vperm.xlu0 %3602, %v4317_v6  }
 0x4a5   :  { %3575 = vset.pattern.permute.xlu1 %v5178_v11  ;;  %3605 = vset.pattern.permute.xlu0 %v5177_v30 }
 0x4a6   :  { %1989 = vperm.xlu1 %3575, %v4303_v38   ;;  %1815 = vperm.xlu0 %3605, %v4317_v6  }
 0x4aa   :  { %3577 = vset.pattern.permute.xlu1 %v5181_v13  ;;  %3610 = vset.pattern.permute.xlu0 %v5176_v52 }
 0x4ab   :  { %2129 = vperm.xlu1 %3577, %v4303_v38   ;;  %2207 = vperm.xlu0 %3610, %v4317_v6  }
 0x4af   :  { %3579 = vset.pattern.permute.xlu1 %v5183_v24  ;;  %3611 = vset.pattern.permute.xlu0 %v5183_v24 }
 0x4b0   :  { %2269 = vperm.xlu1 %3579, %v4303_v38   ;;  %2277 = vperm.xlu0 %3611, %v4317_v6  }
 0x4b4   :  { %3580 = vset.pattern.permute.xlu1 %v3713_v53  ;;  %3613 = vset.pattern.permute.xlu0 %v5184_v39 }
 0x4b5   :  { %2339 = vperm.xlu1 %3580, %v4303_v38   ;;  %2417 = vperm.xlu0 %3613, %v4317_v6  }
 0x4b9   :  { %3581 = vset.pattern.permute.xlu1 %v5184_v39  ;;  %3615 = vset.pattern.permute.xlu0 %v5172_v58 }
 0x4ba   :  { %2409 = vperm.xlu1 %3581, %v4303_v38   ;;  %1955 = vperm.xlu0 %3615, %v4317_v6  }
 0x4be   :  { %3582 = vset.pattern.permute.xlu1 %v5182_v0  ;;  %3620 = vset.pattern.permute.xlu0 %v3716_v56 }
 0x4bf   :  { %1416 = vperm.xlu1 %3582, %v4303_v38   ;;  %1749 = vperm.xlu0 %3620, %v4323_v25  }
 0x4c3   :  { %3583 = vset.pattern.permute.xlu1 %v5172_v58  ;;  %3622 = vset.pattern.permute.xlu0 %v3719_v60 }
 0x4c4   :  { %1947 = vperm.xlu1 %3583, %v4303_v38   ;;  %1889 = vperm.xlu0 %3622, %v4323_v25  }
 0x4c8   :  { %3584 = vset.pattern.permute.xlu1 %v5174_v34  ;;  %3623 = vset.pattern.permute.xlu0 %v5178_v11 }
 0x4c9   :  { %1461 = vperm.xlu1 %3584, %v4307_v15   ;;  %2001 = vperm.xlu0 %3623, %v4323_v25  }
 0x4cd   :  { %3585 = vset.pattern.permute.xlu1 %v5180_v47  ;;  %3625 = vset.pattern.permute.xlu0 %v5181_v13 }
 0x4ce   :  { %1531 = vperm.xlu1 %3585, %v4307_v15   ;;  %2141 = vperm.xlu0 %3625, %v4323_v25  }
 0x4d2   :  { %3586 = vset.pattern.permute.xlu1 %v3706_v37  ;;  %3636 = vset.pattern.permute.xlu0 %v3716_v56 }
 0x4d3   :  { %1601 = vperm.xlu1 %3586, %v4307_v15   ;;  %1753 = vperm.xlu0 %3636, %v4329_v31  }
 0x4d7   :  { %3587 = vset.pattern.permute.xlu1 %v5179_v55  ;;  %3638 = vset.pattern.permute.xlu0 %v3719_v60 }
 0x4d8   :  { %1671 = vperm.xlu1 %3587, %v4307_v15   ;;  %1893 = vperm.xlu0 %3638, %v4329_v31  }
 0x4dc   :  { %3588 = vset.pattern.permute.xlu1 %v3716_v56  ;;  %3639 = vset.pattern.permute.xlu0 %v5178_v11 }
 0x4dd   :  { %1741 = vperm.xlu1 %3588, %v4307_v15   ;;  %2005 = vperm.xlu0 %3639, %v4329_v31  }
 0x4e1   :  { %3589 = vset.pattern.permute.xlu1 %v5177_v30  ;;  %3644 = vset.pattern.permute.xlu0 %v3713_v53 }
 0x4e2   :  { %1811 = vperm.xlu1 %3589, %v4307_v15   ;;  %2355 = vperm.xlu0 %3644, %v4329_v31  }
 0x4e6   :  { %3590 = vset.pattern.permute.xlu1 %v3719_v60  ;;  %3645 = vset.pattern.permute.xlu0 %v5184_v39 }
 0x4e7   :  { %1881 = vperm.xlu1 %3590, %v4307_v15   ;;  %2425 = vperm.xlu0 %3645, %v4329_v31  }
 0x4eb   :  { %3591 = vset.pattern.permute.xlu1 %v5178_v11  ;;  %3646 = vset.pattern.permute.xlu0 %v5182_v0 }
 0x4ec   :  { %1993 = vperm.xlu1 %3591, %v4307_v15   ;;  %1436 = vperm.xlu0 %3646, %v4329_v31  }
 0x4f0   :  { %3592 = vset.pattern.permute.xlu1 %v3711_v16  ;;  %3647 = vset.pattern.permute.xlu0 %v5172_v58 }
 0x4f1   :  { %2063 = vperm.xlu1 %3592, %v4307_v15   ;;  %1963 = vperm.xlu0 %3647, %v4329_v31  }
 0x4f5   :  { %3593 = vset.pattern.permute.xlu1 %v5181_v13  ;;  %3650 = vset.pattern.permute.xlu0 %v3706_v37 }
 0x4f6   :  { %2133 = vperm.xlu1 %3593, %v4307_v15   ;;  %1617 = vperm.xlu0 %3650, %v4333_v57  }
 0x4fa   :  { %3594 = vset.pattern.permute.xlu1 %v5176_v52  ;;  %3658 = vset.pattern.permute.xlu0 %v5176_v52 }
 0x4fb   :  { %2203 = vperm.xlu1 %3594, %v4307_v15   ;;  %2219 = vperm.xlu0 %3658, %v4333_v57  }
 0x4ff   :  { %3595 = vset.pattern.permute.xlu1 %v5183_v24  ;;  %3664 = vset.pattern.permute.xlu0 %v5174_v34 }
 0x500   :  { %2273 = vperm.xlu1 %3595, %v4307_v15   ;;  %1481 = vperm.xlu0 %3664, %v4337_v23  }
 0x502   :  { %v1458_v1 = vpop.permute.xlu1 %1457 }
 0x503   :  { %v1484_v51 = vmul.f32 %v1458_v1, %v4471_v50  ;;  %v4500_v1 = vrot.slane %v3081_v44, %v1262_v22 }
 0x504   :  { %3600 = vset.pattern.permute.xlu1 %v5174_v34  ;;  %3666 = vset.pattern.permute.xlu0 %v3706_v37 }
 0x505   :  { %1465 = vperm.xlu1 %3600, %v4317_v6   ;;  %1621 = vperm.xlu0 %3666, %v4337_v23   ;;  %v4510_v14 = vadd.f32 %v4301_v33, %v4500_v1 }
 0x507   :  { %v1528_v2 = vpop.permute.xlu1 %1527 }
 0x508   :  { %v1554_v63 = vmul.f32 %v1528_v2, %v4471_v50  ;;  %v4504_v2 = vpop.permute.xlu0 %2059 }
 0x509   :  { %3601 = vset.pattern.permute.xlu1 %v5180_v47  ;;  %3668 = vset.pattern.permute.xlu0 %v3716_v56 }
 0x50a   :  { %1535 = vperm.xlu1 %3601, %v4317_v6   ;;  %1761 = vperm.xlu0 %3668, %v4337_v23  }
 0x50c   :  { %v1598_v3 = vpop.permute.xlu1 %1597  ;;  %v2200_v42 = vpop.permute.xlu0 %2199 }
 0x50d   :  { %v1624_v9 = vmul.f32 %v1598_v3, %v4471_v50 }
 0x50e   :  { %3603 = vset.pattern.permute.xlu1 %v5179_v55  ;;  %3670 = vset.pattern.permute.xlu0 %v3719_v60 }
 0x50f   :  { %1675 = vperm.xlu1 %3603, %v4317_v6   ;;  %1901 = vperm.xlu0 %3670, %v4337_v23  }
 0x511   :  { %v1668_v40 = vpop.permute.xlu1 %1667 }
 0x512   :  { %v1694_v43 = vmul.f32 %v1668_v40, %v4471_v50 }
 0x513   :  { %3604 = vset.pattern.permute.xlu1 %v3716_v56  ;;  %3672 = vset.pattern.permute.xlu0 %v3711_v16 }
 0x514   :  { %1745 = vperm.xlu1 %3604, %v4317_v6   ;;  %2083 = vperm.xlu0 %3672, %v4337_v23  }
 0x516   :  { %v1738_v46 = vpop.permute.xlu1 %1737 }
 0x517   :  { %v1764_v21 = vmul.f32 %v1738_v46, %v4471_v50  ;;  %v2226_v46 = vmul.f32 %v2200_v42, %v4510_v14 }
 0x518   :  { %3606 = vset.pattern.permute.xlu1 %v3719_v60  ;;  %3676 = vset.pattern.permute.xlu0 %v3713_v53 }
 0x519   :  { %1885 = vperm.xlu1 %3606, %v4317_v6   ;;  %2363 = vperm.xlu0 %3676, %v4337_v23  }
 0x51b   :  { %v1808_v35 = vpop.permute.xlu1 %1807 }
 0x51c   :  { %v1834_v17 = vmul.f32 %v1808_v35, %v4471_v50 }
 0x51d   :  { %3607 = vset.pattern.permute.xlu1 %v5178_v11  ;;  %3678 = vset.pattern.permute.xlu0 %v5182_v0 }
 0x51e   :  { %1997 = vperm.xlu1 %3607, %v4317_v6   ;;  %1446 = vperm.xlu0 %3678, %v4337_v23  }
 0x520   :  { %v1878_v7 = vpop.permute.xlu1 %1877 }
 0x521   :  { %v1904_v3 = vmul.f32 %v1878_v7, %v4471_v50 }
 0x522   :  { %3608 = vset.pattern.permute.xlu1 %v3711_v16  ;;  %1498 = vrot.lane.b32.xlu0 %v1484_v51, %s3708_s13 }
 0x523   :  { %2067 = vperm.xlu1 %3608, %v4317_v6  }
 0x525   :  { %v1990_v38 = vpop.permute.xlu1 %1989 }
 0x526   :  { %1568 = vrot.lane.b32.xlu0 %v1554_v63, %s3709_s16  ;;  %v2016_v40 = vmul.f32 %v1990_v38, %v4510_v14 }
 0x527   :  { %3609 = vset.pattern.permute.xlu1 %v5181_v13 }
 0x528   :  { %2137 = vperm.xlu1 %3609, %v4317_v6  }
 0x52a   :  { %v4486_v15 = vpop.permute.xlu1 %2129  ;;  %1638 = vrot.lane.b32.xlu0 %v1624_v9, %s3710_s17 }
 0x52c   :  { %3612 = vset.pattern.permute.xlu1 %v3713_v53 }
 0x52d   :  { %2347 = vperm.xlu1 %3612, %v4317_v6  }
 0x52e   :  { %1708 = vrot.lane.b32.xlu0 %v1694_v43, %s3723_s19 }
 0x52f   :  { %v4493_v45 = vpop.permute.xlu1 %2269 }
 0x531   :  { %3614 = vset.pattern.permute.xlu1 %v5182_v0 }
 0x532   :  { %1426 = vperm.xlu1 %3614, %v4317_v6   ;;  %1778 = vrot.lane.b32.xlu0 %v1764_v21, %s3724_s20 }
 0x534   :  { %v2340_v10 = vpop.permute.xlu1 %2339 }
 0x535   :  { %v2366_v35 = vmul.f32 %v2340_v10, %v4510_v14  ;;  %v4562_v10 = vpop.permute.xlu0 %2343 }
 0x536   :  { %3616 = vset.pattern.permute.xlu1 %v5174_v34  ;;  %1848 = vrot.lane.b32.xlu0 %v1834_v17, %s3725_s0 }
 0x537   :  { %1469 = vperm.xlu1 %3616, %v4323_v25  }
 0x539   :  { %v2410_v6 = vpop.permute.xlu1 %2409  ;;  %v4573_v42 = vpop.permute.xlu0 %2413 }
 0x53a   :  { %1918 = vrot.lane.b32.xlu0 %v1904_v3, %s3726_s21  ;;  %v2436_v51 = vmul.f32 %v2410_v6, %v4510_v14  ;;  %v4567_v3 = vadd.f32 %v4315_v49, %v4500_v1 }
 0x53b   :  { %3617 = vset.pattern.permute.xlu1 %v5180_v47 }
 0x53c   :  { %1539 = vperm.xlu1 %3617, %v4323_v25  }
 0x53d   :  { %v4579_v49 = vpop.permute.xlu0 %1421 }
 0x53e   :  { %v4516_v44 = vpop.permute.xlu1 %1416  ;;  %2030 = vrot.lane.b32.xlu0 %v2016_v40, %s3708_s13 }
 0x540   :  { %3618 = vset.pattern.permute.xlu1 %v3706_v37 }
 0x541   :  { %1609 = vperm.xlu1 %3618, %v4323_v25  }
 0x542   :  { %2240 = vrot.lane.b32.xlu0 %v2226_v46, %s3723_s19 }
 0x543   :  { %v4523_v33 = vpop.permute.xlu1 %1947 }
 0x545   :  { %3619 = vset.pattern.permute.xlu1 %v5179_v55 }
 0x546   :  { %1679 = vperm.xlu1 %3619, %v4323_v25   ;;  %2380 = vrot.lane.b32.xlu0 %v2366_v35, %s3725_s0 }
 0x548   :  { %v4530_v7 = vpop.permute.xlu1 %1461 }
 0x54a   :  { %3621 = vset.pattern.permute.xlu1 %v5177_v30  ;;  %2450 = vrot.lane.b32.xlu0 %v2436_v51, %s3726_s21 }
 0x54b   :  { %1819 = vperm.xlu1 %3621, %v4323_v25  }
 0x54d   :  { %v4535_v63 = vpop.permute.xlu1 %1531 }
 0x54f   :  { %3624 = vset.pattern.permute.xlu1 %v3711_v16 }
 0x550   :  { %2071 = vperm.xlu1 %3624, %v4323_v25  }
 0x552   :  { %v4539_v38 = vpop.permute.xlu1 %1601 }
 0x554   :  { %3626 = vset.pattern.permute.xlu1 %v5176_v52 }
 0x555   :  { %2211 = vperm.xlu1 %3626, %v4323_v25  }
 0x557   :  { %v4543_v9 = vpop.permute.xlu1 %1671 }
 0x559   :  { %3627 = vset.pattern.permute.xlu1 %v5183_v24 }
 0x55a   :  { %2281 = vperm.xlu1 %3627, %v4323_v25  }
 0x55c   :  { %v4547_v43 = vpop.permute.xlu1 %1741 }
 0x55e   :  { %3628 = vset.pattern.permute.xlu1 %v3713_v53 }
 0x55f   :  { %2351 = vperm.xlu1 %3628, %v4323_v25  }
 0x561   :  { %v4551_v21 = vpop.permute.xlu1 %1811 }
 0x563   :  { %3629 = vset.pattern.permute.xlu1 %v5184_v39 }
 0x564   :  { %2421 = vperm.xlu1 %3629, %v4323_v25  }
 0x566   :  { %v4555_v22 = vpop.permute.xlu1 %1881 }
 0x568   :  { %3630 = vset.pattern.permute.xlu1 %v5182_v0 }
 0x569   :  { %1431 = vperm.xlu1 %3630, %v4323_v25  }
 0x56b   :  { %v4559_v17 = vpop.permute.xlu1 %1993 }
 0x56d   :  { %3631 = vset.pattern.permute.xlu1 %v5172_v58 }
 0x56e   :  { %1959 = vperm.xlu1 %3631, %v4323_v25  }
 0x570   :  { %v2064_v6 = vpop.permute.xlu1 %2063 }
 0x571   :  { %v2087_v40 = vmul.f32 %v2064_v6, %v4567_v3  ;;  %v4585_v6 = vpop.permute.xlu0 %1951 }
 0x572   :  { %3632 = vset.pattern.permute.xlu1 %v5174_v34 }
 0x573   :  { %1473 = vperm.xlu1 %3632, %v4329_v31   ;;  %2102 = vrot.lane.b32.xlu0 %v2087_v40, %s3709_s16 }
 0x575   :  { %v2134_v46 = vpop.permute.xlu1 %2133  ;;  %v1606_v5 = vpop.permute.xlu0 %1605 }
 0x576   :  { %v2157_v35 = vmul.f32 %v2134_v46, %v4567_v3  ;;  %v4593_v46 = vadd.f32 %v4343_v59, %v4463_v48 }
 0x577   :  { %3633 = vset.pattern.permute.xlu1 %v5180_v47 }
 0x578   :  { %1543 = vperm.xlu1 %3633, %v4329_v31   ;;  %2172 = vrot.lane.b32.xlu0 %v2157_v35, %s3710_s17 }
 0x579   :  { %v4614_v58 = vpop.permute.xlu0 %1815 }
 0x57a   :  { %v4581_v25 = vpop.permute.xlu1 %2203 }
 0x57c   :  { %3634 = vset.pattern.permute.xlu1 %v3706_v37 }
 0x57d   :  { %1613 = vperm.xlu1 %3634, %v4329_v31  }
 0x57f   :  { %v2274_v51 = vpop.permute.xlu1 %2273 }
 0x580   :  { %v2297_v40 = vmul.f32 %v2274_v51, %v4567_v3  ;;  %v1626_v51 = vmul.f32 %v1606_v5, %v4593_v46 }
 0x581   :  { %3635 = vset.pattern.permute.xlu1 %v5179_v55 }
 0x582   :  { %1683 = vperm.xlu1 %3635, %v4329_v31   ;;  %2312 = vrot.lane.b32.xlu0 %v2297_v40, %s3724_s20 }
 0x584   :  { %v1466_v35 = vpop.permute.xlu1 %1465 }
 0x585   :  { %v1486_v37 = vmul.f32 %v1466_v35, %v4593_v46 }
 0x586   :  { %3637 = vset.pattern.permute.xlu1 %v5177_v30 }
 0x587   :  { %1823 = vperm.xlu1 %3637, %v4329_v31   ;;  %1502 = vrot.lane.b32.xlu0 %v1486_v37, %s3708_s13 }
 0x589   :  { %v4600_v8 = vpop.permute.xlu1 %1535 }
 0x58b   :  { %3640 = vset.pattern.permute.xlu1 %v3711_v16  ;;  %1642 = vrot.lane.b32.xlu0 %v1626_v51, %s3710_s17 }
 0x58c   :  { %2075 = vperm.xlu1 %3640, %v4329_v31  }
 0x58e   :  { %v1676_v59 = vpop.permute.xlu1 %1675 }
 0x58f   :  { %v1696_v40 = vmul.f32 %v1676_v59, %v4593_v46 }
 0x590   :  { %3641 = vset.pattern.permute.xlu1 %v5181_v13 }
 0x591   :  { %2145 = vperm.xlu1 %3641, %v4329_v31   ;;  %1712 = vrot.lane.b32.xlu0 %v1696_v40, %s3723_s19  ;;  %v2208_v40 = vpop.permute.xlu0 %2207 }
 0x593   :  { %v1746_v35 = vpop.permute.xlu1 %1745 }
 0x594   :  { %v1766_v5 = vmul.f32 %v1746_v35, %v4593_v46  ;;  %v4625_v35 = vadd.f32 %v4353_v12, %v4500_v1 }
 0x595   :  { %3642 = vset.pattern.permute.xlu1 %v5176_v52 }
 0x596   :  { %2215 = vperm.xlu1 %3642, %v4329_v31   ;;  %1782 = vrot.lane.b32.xlu0 %v1766_v5, %s3724_s20 }
 0x598   :  { %v1886_v37 = vpop.permute.xlu1 %1885 }
 0x599   :  { %v1906_v51 = vmul.f32 %v1886_v37, %v4593_v46 }
 0x59a   :  { %3643 = vset.pattern.permute.xlu1 %v5183_v24 }
 0x59b   :  { %2285 = vperm.xlu1 %3643, %v4329_v31   ;;  %1922 = vrot.lane.b32.xlu0 %v1906_v51, %s3726_s21  ;;  %v2278_v31 = vpop.permute.xlu0 %2277  ;;  %v2228_v51 = vmul.f32 %v2208_v40, %v4625_v35 }
 0x59c   :  { %v2298_v12 = vmul.f32 %v2278_v31, %v4625_v35 }
 0x59d   :  { %v4619_v59 = vpop.permute.xlu1 %1997 }
 0x59f   :  { %3648 = vset.pattern.permute.xlu1 %v5174_v34 }
 0x5a0   :  { %1477 = vperm.xlu1 %3648, %v4333_v57  }
 0x5a2   :  { %v2068_v5 = vpop.permute.xlu1 %2067 }
 0x5a3   :  { %v2088_v37 = vmul.f32 %v2068_v5, %v4625_v35  ;;  %v2418_v5 = vpop.permute.xlu0 %2417 }
 0x5a4   :  { %3649 = vset.pattern.permute.xlu1 %v5180_v47  ;;  %v4677_v47 = vadd.f32 %v4381_v62, %v4500_v1 }
 0x5a5   :  { %1547 = vperm.xlu1 %3649, %v4333_v57   ;;  %2104 = vrot.lane.b32.xlu0 %v2088_v37, %s3709_s16  ;;  %v2438_v37 = vmul.f32 %v2418_v5, %v4625_v35 }
 0x5a7   :  { %v4632_v34 = vpop.permute.xlu1 %2137 }
 0x5a9   :  { %3651 = vset.pattern.permute.xlu1 %v5179_v55  ;;  %2244 = vrot.lane.b32.xlu0 %v2228_v51, %s3723_s19  ;;  %v4651_v51 = vpop.permute.xlu0 %1955 }
 0x5aa   :  { %1687 = vperm.xlu1 %3651, %v4333_v57   ;;  %5200 = vst [vmem:[#allocation8_spill] sm:$0xff] %v4651_v51 }
 0x5ac   :  { %v4638_v52 = vpop.permute.xlu1 %2347 }
 0x5ad   :  { %2314 = vrot.lane.b32.xlu0 %v2298_v12, %s3724_s20  ;;  %v4658_v12 = vpop.permute.xlu0 %1749 }
 0x5ae   :  { %3652 = vset.pattern.permute.xlu1 %v3716_v56 }
 0x5af   :  { %1757 = vperm.xlu1 %3652, %v4333_v57  }
 0x5b1   :  { %v4644_v40 = vpop.permute.xlu1 %1426  ;;  %2454 = vrot.lane.b32.xlu0 %v2438_v37, %s3726_s21  ;;  %v4665_v37 = vpop.permute.xlu0 %1889 }
 0x5b2   :  { %5199 = vst [vmem:[#allocation7_spill] sm:$0xff] %v4644_v40 }
 0x5b3   :  { %3653 = vset.pattern.permute.xlu1 %v5177_v30 }
 0x5b4   :  { %1827 = vperm.xlu1 %3653, %v4333_v57  }
 0x5b6   :  { %v4649_v31 = vpop.permute.xlu1 %1469 }
 0x5b8   :  { %3654 = vset.pattern.permute.xlu1 %v3719_v60  ;;  %v4673_v60 = vadd.f32 %v4371_v20, %v4463_v48 }
 0x5b9   :  { %1897 = vperm.xlu1 %3654, %v4333_v57  }
 0x5bb   :  { %v4655_v56 = vpop.permute.xlu1 %1539 }
 0x5bd   :  { %3655 = vset.pattern.permute.xlu1 %v5178_v11  ;;  %v2002_v11 = vpop.permute.xlu0 %2001 }
 0x5be   :  { %2009 = vperm.xlu1 %3655, %v4333_v57  }
 0x5c0   :  { %v4661_v5 = vpop.permute.xlu1 %1609 }
 0x5c1   :  { %v2142_v20 = vpop.permute.xlu0 %2141 }
 0x5c2   :  { %3656 = vset.pattern.permute.xlu1 %v3711_v16  ;;  %v2159_v62 = vmul.f32 %v2142_v20, %v4677_v47 }
 0x5c3   :  { %2079 = vperm.xlu1 %3656, %v4333_v57  }
 0x5c5   :  { %v4667_v30 = vpop.permute.xlu1 %1679 }
 0x5c7   :  { %3657 = vset.pattern.permute.xlu1 %v5181_v13  ;;  %v2019_v13 = vmul.f32 %v2002_v11, %v4677_v47 }
 0x5c8   :  { %2149 = vperm.xlu1 %3657, %v4333_v57  }
 0x5ca   :  { %v1820_v55 = vpop.permute.xlu1 %1819 }
 0x5cb   :  { %v1837_v16 = vmul.f32 %v1820_v55, %v4673_v60 }
 0x5cc   :  { %3659 = vset.pattern.permute.xlu1 %v5183_v24  ;;  %v5202_v24 = vmov 8  }
 0x5cd   :  { %2289 = vperm.xlu1 %3659, %v4333_v57   ;;  %1854 = vrot.lane.b32.xlu0 %v1837_v16, %s3725_s0  ;;  %v5201_v16 = vmov 0  }
 0x5cf   :  { %v4684_v0 = vpop.permute.xlu1 %2071 }
 0x5d1   :  { %3660 = vset.pattern.permute.xlu1 %v3713_v53  ;;  %2036 = vrot.lane.b32.xlu0 %v2019_v13, %s3708_s13 }
 0x5d2   :  { %2359 = vperm.xlu1 %3660, %v4333_v57  }
 0x5d4   :  { %v4690_v55 = vpop.permute.xlu1 %2211 }
 0x5d5   :  { %2176 = vrot.lane.b32.xlu0 %v2159_v62, %s3710_s17  ;;  %v5203_v62 = vmov 2  }
 0x5d6   :  { %3661 = vset.pattern.permute.xlu1 %v5184_v39 }
 0x5d7   :  { %2429 = vperm.xlu1 %3661, %v4333_v57  }
 0x5d9   :  { %v4695_v11 = vpop.permute.xlu1 %2281 }
 0x5db   :  { %3662 = vset.pattern.permute.xlu1 %v5201_v16  ;;  %v5205_v16 = vmov 4  }
 0x5dc   :  { %1441 = vperm.xlu1 %3662, %v4333_v57  }
 0x5de   :  { %v2352_v53 = vpop.permute.xlu1 %2351 }
 0x5df   :  { %v2369_v13 = vmul.f32 %v2352_v53, %v4677_v47  ;;  %v1754_v53 = vpop.permute.xlu0 %1753 }
 0x5e0   :  { %3663 = vset.pattern.permute.xlu1 %v5202_v24 }
 0x5e1   :  { %1967 = vperm.xlu1 %3663, %v4333_v57   ;;  %2386 = vrot.lane.b32.xlu0 %v2369_v13, %s3725_s0  ;;  %v4717_v57 = vadd.f32 %v4391_v27, %v4463_v48 }
 0x5e3   :  { %v4703_v20 = vpop.permute.xlu1 %2421  ;;  %v4721_v4 = vpop.permute.xlu0 %1893 }
 0x5e5   :  { %3665 = vset.pattern.permute.xlu1 %v5203_v62 }
 0x5e6   :  { %1551 = vperm.xlu1 %3665, %v4337_v23  }
 0x5e7   :  { %v4729_v27 = vpop.permute.xlu0 %2005 }
 0x5e8   :  { %v4707_v39 = vpop.permute.xlu1 %1431 }
 0x5e9   :  { %5204 = vst [vmem:[#allocation9_spill] sm:$0xff] %v4707_v39  ;;  %v5211_v39 = vmov 13  }
 0x5ea   :  { %3667 = vset.pattern.permute.xlu1 %v5205_v16 }
 0x5eb   :  { %1691 = vperm.xlu1 %3667, %v4337_v23  }
 0x5ed   :  { %v4711_v19 = vpop.permute.xlu1 %1959 }
 0x5ee   :  { %5206 = vst [vmem:[#allocation10_spill] sm:$0xff] %v4711_v19  ;;  %v5210_v19 = vmov 12  }
 0x5ef   :  { %3669 = vset.pattern.permute.xlu1 %v5207_v36 }
 0x5f0   :  { %1831 = vperm.xlu1 %3669, %v4337_v23  }
 0x5f2   :  { %v1474_v13 = vpop.permute.xlu1 %1473 }
 0x5f3   :  { %v1488_v62 = vmul.f32 %v1474_v13, %v4717_v57 }
 0x5f4   :  { %3671 = vset.pattern.permute.xlu1 %v5208_v32 }
 0x5f5   :  { %2013 = vperm.xlu1 %3671, %v4337_v23   ;;  %1506 = vrot.lane.b32.xlu0 %v1488_v62, %s3708_s13  ;;  %v1768_v62 = vmul.f32 %v1754_v53, %v4717_v57  ;;  %v4751_v53 = vadd.f32 %v4401_v29, %v4500_v1 }
 0x5f7   :  { %v1544_v16 = vpop.permute.xlu1 %1543 }
 0x5f8   :  { %v1558_v36 = vmul.f32 %v1544_v16, %v4717_v57  ;;  %v4736_v16 = vpop.permute.xlu0 %2355 }
 0x5f9   :  { %3673 = vset.pattern.permute.xlu1 %v5209_v41 }
 0x5fa   :  { %2153 = vperm.xlu1 %3673, %v4337_v23   ;;  %1576 = vrot.lane.b32.xlu0 %v1558_v36, %s3709_s16 }
 0x5fc   :  { %v1614_v13 = vpop.permute.xlu1 %1613 }
 0x5fd   :  { %v1628_v32 = vmul.f32 %v1614_v13, %v4717_v57  ;;  %v4745_v13 = vpop.permute.xlu0 %2425 }
 0x5fe   :  { %3674 = vset.pattern.permute.xlu1 %v5210_v19  ;;  %v5212_v19 = vmov 15  }
 0x5ff   :  { %2223 = vperm.xlu1 %3674, %v4337_v23   ;;  %1646 = vrot.lane.b32.xlu0 %v1628_v32, %s3710_s17 }
 0x601   :  { %v4738_v41 = vpop.permute.xlu1 %1683 }
 0x603   :  { %3675 = vset.pattern.permute.xlu1 %v5211_v39  ;;  %1786 = vrot.lane.b32.xlu0 %v1768_v62, %s3724_s20  ;;  %v4754_v39 = vpop.permute.xlu0 %1436  ;;  %v2086_v62 = vmul.f32 %v4504_v2, %v4510_v14  ;;  %v2296_v2 = vmul.f32 %v4493_v45, %v4510_v14 }
 0x604   :  { %2293 = vperm.xlu1 %3675, %v4337_v23   ;;  %5213 = vst [vmem:[#allocation11_spill] sm:$0xff] %v4754_v39 }
 0x606   :  { %v4743_v36 = vpop.permute.xlu1 %1823 }
 0x607   :  { %v4763_v29 = vpop.permute.xlu0 %1963 }
 0x608   :  { %3677 = vset.pattern.permute.xlu1 %v5212_v19  ;;  %5214 = vst [vmem:[#allocation12_spill] sm:$0xff] %v4763_v29 }
 0x609   :  { %2433 = vperm.xlu1 %3677, %v4337_v23  }
 0x60b   :  { %v2076_v32 = vpop.permute.xlu1 %2075 }
 0x60c   :  { %v2090_v51 = vmul.f32 %v2076_v32, %v4751_v53  ;;  %v5215_v32 = vmov 1  }
 0x60d   :  { %3679 = vset.pattern.permute.xlu1 %v5202_v24  ;;  %v2156_v24 = vmul.f32 %v4486_v15, %v4510_v14 }
 0x60e   :  { %1971 = vperm.xlu1 %3679, %v4337_v23   ;;  %2108 = vrot.lane.b32.xlu0 %v2090_v51, %s3709_s16  ;;  %v4774_v51 = vpop.permute.xlu0 %1617 }
 0x610   :  { %v2146_v19 = vpop.permute.xlu1 %2145 }
 0x611   :  { %v2160_v40 = vmul.f32 %v2146_v19, %v4751_v53 }
 0x612   :  { %2100 = vrot.lane.b32.xlu1 %v2086_v62, %s3709_s16  ;;  %v4778_v62 = vadd.f32 %v4313_v18, %v4463_v48 }
 0x613   :  { %2178 = vrot.lane.b32.xlu0 %v2160_v40, %s3710_s17  ;;  %3680 = vset.pattern.permute.xlu1 %v5215_v32 }
 0x614   :  { %v1485_v15 = vmul.f32 %v4530_v7, %v4778_v62  ;;  %v1555_v29 = vmul.f32 %v4535_v63, %v4778_v62  ;;  %v1625_v18 = vmul.f32 %v4539_v38, %v4778_v62  ;;  %v1695_v7 = vmul.f32 %v4543_v9, %v4778_v62 }
 0x615   :  { %v4769_v23 = vpop.permute.xlu1 %2215  ;;  %v1765_v38 = vmul.f32 %v4547_v43, %v4778_v62  ;;  %v1835_v9 = vmul.f32 %v4551_v21, %v4778_v62 }
 0x616   :  { %2170 = vrot.lane.b32.xlu1 %v2156_v24, %s3710_s17  ;;  %v2220_v24 = vpop.permute.xlu0 %2219 }
 0x61a   :  { %v2286_v19 = vpop.permute.xlu1 %2285  ;;  %2310 = vrot.lane.b32.xlu1 %v2296_v2, %s3724_s20 }
 0x61b   :  { %v2300_v40 = vmul.f32 %v2286_v19, %v4751_v53  ;;  %v1482_v19 = vpop.permute.xlu0 %1481 }
 0x61d   :  { %2318 = vrot.lane.b32.xlu0 %v2300_v40, %s3724_s20  ;;  %v4800_v40 = vadd.f32 %v4423_v54, %v4463_v48 }
 0x61e   :  { %1500 = vrot.lane.b32.xlu1 %v1485_v15, %s3708_s13 }
 0x61f   :  { %v4786_v45 = vpop.permute.xlu1 %1477 }
 0x622   :  { %1570 = vrot.lane.b32.xlu1 %v1555_v29, %s3709_s16  ;;  %v1622_v29 = vpop.permute.xlu0 %1621 }
 0x624   :  { %v4793_v2 = vpop.permute.xlu1 %1547 }
 0x626   :  { %1640 = vrot.lane.b32.xlu1 %v1625_v18, %s3710_s17  ;;  %v4812_v54 = vpop.permute.xlu0 %1761 }
 0x629   :  { %v1688_v15 = vpop.permute.xlu1 %1687 }
 0x62a   :  { %v1699_v63 = vmul.f32 %v1688_v15, %v4800_v40  ;;  %1710 = vrot.lane.b32.xlu1 %v1695_v7, %s3723_s19  ;;  %v1905_v7 = vmul.f32 %v4555_v22, %v4778_v62  ;;  %v4820_v43 = vpop.permute.xlu0 %1901  ;;  %v4829_v22 = vadd.f32 %v4429_v61, %v4500_v1 }
 0x62c   :  { %1718 = vrot.lane.b32.xlu0 %v1699_v63, %s3723_s19  ;;  %v2017_v63 = vmul.f32 %v4559_v17, %v4567_v3  ;;  %v2367_v17 = vmul.f32 %v4562_v10, %v4567_v3  ;;  %v1556_v10 = vmul.f32 %v4600_v8, %v4593_v46  ;;  %v4868_v8 = vadd.f32 %v4435_v28, %v4463_v48 }
 0x62d   :  { %v2368_v28 = vmul.f32 %v4638_v52, %v4625_v35  ;;  %v1557_v52 = vmul.f32 %v4655_v56, %v4673_v60 }
 0x62e   :  { %v4807_v39 = vpop.permute.xlu1 %1757  ;;  %1780 = vrot.lane.b32.xlu1 %v1765_v38, %s3724_s20  ;;  %v1630_v48 = vmul.f32 %v1622_v29, %v4868_v8  ;;  %v1627_v29 = vmul.f32 %v4661_v5, %v4673_v60 }
 0x632   :  { %1850 = vrot.lane.b32.xlu1 %v1835_v9, %s3725_s0  ;;  %v2227_v9 = vmul.f32 %v4581_v25, %v4567_v3  ;;  %v2437_v25 = vmul.f32 %v4573_v42, %v4567_v3 }
 0x633   :  { %v1828_v18 = vpop.permute.xlu1 %1827 }
 0x634   :  { %v1839_v15 = vmul.f32 %v1828_v18, %v4800_v40  ;;  %v4833_v18 = vpop.permute.xlu0 %2083 }
 0x636   :  { %1920 = vrot.lane.b32.xlu1 %v1905_v7, %s3726_s21  ;;  %1858 = vrot.lane.b32.xlu0 %v1839_v15, %s3725_s0 }
 0x638   :  { %v1898_v21 = vpop.permute.xlu1 %1897  ;;  %v4844_v61 = vpop.permute.xlu0 %2363 }
 0x639   :  { %v1909_v38 = vmul.f32 %v1898_v21, %v4800_v40 }
 0x63a   :  { %2032 = vrot.lane.b32.xlu1 %v2017_v63, %s3708_s13  ;;  %v2231_v63 = vmul.f32 %v2220_v24, %v4829_v22  ;;  %v1836_v24 = vmul.f32 %v4614_v58, %v4593_v46  ;;  %v2158_v58 = vmul.f32 %v4632_v34, %v4625_v35 }
 0x63b   :  { %1928 = vrot.lane.b32.xlu0 %v1909_v38, %s3726_s21 }
 0x63d   :  { %v2010_v7 = vpop.permute.xlu1 %2009 }
 0x63e   :  { %v2021_v15 = vmul.f32 %v2010_v7, %v4829_v22  ;;  %2242 = vrot.lane.b32.xlu1 %v2227_v9, %s3723_s19  ;;  %v4854_v9 = vpop.permute.xlu0 %1446 }
 0x640   :  { %2040 = vrot.lane.b32.xlu0 %v2021_v15, %s3708_s13  ;;  %v2018_v15 = vmul.f32 %v4619_v59, %v4625_v35 }
 0x642   :  { %v4841_v21 = vpop.permute.xlu1 %2079  ;;  %2382 = vrot.lane.b32.xlu1 %v2367_v17, %s3725_s0  ;;  %v4862_v42 = vpop.permute.xlu0 %1498 }
 0x644   :  { %2250 = vrot.lane.b32.xlu0 %v2231_v63, %s3723_s19 }
 0x646   :  { %2452 = vrot.lane.b32.xlu1 %v2437_v25, %s3726_s21  ;;  %v4875_v25 = vpop.permute.xlu0 %1568 }
 0x647   :  { %v4850_v38 = vpop.permute.xlu1 %2149 }
 0x64a   :  { %1572 = vrot.lane.b32.xlu1 %v1556_v10, %s3709_s16  ;;  %v1490_v10 = vmul.f32 %v1482_v19, %v4868_v8  ;;  %v4886_v34 = vpop.permute.xlu0 %1638  ;;  %v1487_v19 = vmul.f32 %v4649_v31, %v4673_v60 }
 0x64c   :  { %v4859_v7 = vpop.permute.xlu1 %2289 }
 0x64e   :  { %1852 = vrot.lane.b32.xlu1 %v1836_v24, %s3725_s0 }
 0x651   :  { %v2360_v17 = vpop.permute.xlu1 %2359 }
 0x652   :  { %v2371_v63 = vmul.f32 %v2360_v17, %v4829_v22  ;;  %2034 = vrot.lane.b32.xlu1 %v2018_v15, %s3708_s13  ;;  %v4898_v17 = vpop.permute.xlu0 %1708 }
 0x654   :  { %2390 = vrot.lane.b32.xlu0 %v2371_v63, %s3725_s0 }
 0x656   :  { %v4878_v24 = vpop.permute.xlu1 %2429  ;;  %2174 = vrot.lane.b32.xlu1 %v2158_v58, %s3710_s17  ;;  %v4906_v31 = vpop.permute.xlu0 %1778  ;;  %v1697_v58 = vmul.f32 %v4667_v30, %v4673_v60 }
 0x658   :  { %1510 = vrot.lane.b32.xlu0 %v1490_v10, %s3708_s13 }
 0x65a   :  { %2384 = vrot.lane.b32.xlu1 %v2368_v28, %s3725_s0  ;;  %v1767_v28 = vmul.f32 %v4658_v12, %v4673_v60  ;;  %v2440_v12 = vmul.f32 %v4745_v13, %v4751_v53 }
 0x65b   :  { %v4888_v59 = vpop.permute.xlu1 %1441 }
 0x65c   :  { %1650 = vrot.lane.b32.xlu0 %v1630_v48, %s3710_s17  ;;  %v4914_v48 = vpop.permute.xlu0 %1848 }
 0x65e   :  { %1504 = vrot.lane.b32.xlu1 %v1487_v19, %s3708_s13  ;;  %v1907_v19 = vmul.f32 %v4665_v37, %v4673_v60  ;;  %v2229_v37 = vmul.f32 %v4690_v55, %v4677_v47 }
 0x660   :  { %v4896_v15 = vpop.permute.xlu1 %1967 }
 0x662   :  { %1574 = vrot.lane.b32.xlu1 %v1557_v52, %s3709_s16  ;;  %v4923_v52 = vpop.permute.xlu0 %1918 }
 0x665   :  { %v4903_v63 = vpop.permute.xlu1 %1551 }
 0x666   :  { %1644 = vrot.lane.b32.xlu1 %v1627_v29, %s3710_s17  ;;  %v2089_v29 = vmul.f32 %v4684_v0, %v4677_v47  ;;  %v2299_v0 = vmul.f32 %v4695_v11, %v4677_v47 }
 0x66a   :  { %1714 = vrot.lane.b32.xlu1 %v1697_v58, %s3723_s19  ;;  %v1692_v56 = vpop.permute.xlu1 %1691 }
 0x66b   :  { %v1700_v10 = vmul.f32 %v1692_v56, %v4868_v8  ;;  %v4931_v56 = vadd.f32 %v4454_v26, %v4500_v1 }
 0x66d   :  { %1720 = vrot.lane.b32.xlu0 %v1700_v10, %s3723_s19 }
 0x66e   :  { %1784 = vrot.lane.b32.xlu1 %v1767_v28, %s3724_s20  ;;  %v4938_v28 = vpop.permute.xlu0 %2030 }
 0x66f   :  { %v1832_v5 = vpop.permute.xlu1 %1831 }
 0x670   :  { %v1840_v30 = vmul.f32 %v1832_v5, %v4868_v8  ;;  %v2439_v5 = vmul.f32 %v4703_v20, %v4677_v47 }
 0x672   :  { %1924 = vrot.lane.b32.xlu1 %v1907_v19, %s3726_s21  ;;  %1860 = vrot.lane.b32.xlu0 %v1840_v30, %s3725_s0  ;;  %v4949_v55 = vpop.permute.xlu0 %2240  ;;  %v1698_v30 = vmul.f32 %v4738_v41, %v4717_v57  ;;  %v1908_v41 = vmul.f32 %v4721_v4, %v4717_v57  ;;  %v2230_v4 = vmul.f32 %v4769_v23, %v4751_v53 }
 0x674   :  { %v2014_v58 = vpop.permute.xlu1 %2013 }
 0x675   :  { %v2022_v10 = vmul.f32 %v2014_v58, %v4931_v56 }
 0x676   :  { %2106 = vrot.lane.b32.xlu1 %v2089_v29, %s3709_s16  ;;  %2458 = vrot.lane.b32.xlu0 %v2440_v12, %s3726_s21  ;;  %v4957_v12 = vpop.permute.xlu0 %2380  ;;  %v1838_v29 = vmul.f32 %v4743_v36, %v4717_v57 }
 0x679   :  { %v2154_v13 = vpop.permute.xlu1 %2153 }
 0x67a   :  { %2246 = vrot.lane.b32.xlu1 %v2229_v37, %s3723_s19  ;;  %2042 = vrot.lane.b32.xlu0 %v2022_v10, %s3708_s13  ;;  %v2162_v26 = vmul.f32 %v2154_v13, %v4931_v56  ;;  %v4965_v37 = vpop.permute.xlu0 %2450  ;;  %v4973_v10 = vld [vmem:[%s5166_s3] sm:$0xff] }
 0x67e   :  { %2316 = vrot.lane.b32.xlu1 %v2299_v0, %s3724_s20  ;;  %v4946_v1 = vpop.permute.xlu1 %2223  ;;  %2182 = vrot.lane.b32.xlu0 %v2162_v26, %s3710_s17  ;;  %v4978_v36 = vpop.permute.xlu0 %2102  ;;  %v2020_v0 = vmul.f32 %v4729_v27, %v4751_v53  ;;  %v1449_v27 = vmul.f32 %v4516_v44, %v4471_v50  ;;  %v1629_v50 = vmul.f32 %v4774_v51, %v4800_v40 }
 0x682   :  { %2456 = vrot.lane.b32.xlu1 %v2439_v5, %s3726_s21  ;;  %v4987_v5 = vpop.permute.xlu0 %2172 }
 0x683   :  { %v2294_v19 = vpop.permute.xlu1 %2293 }
 0x684   :  { %v2302_v11 = vmul.f32 %v2294_v19, %v4931_v56 }
 0x686   :  { %1716 = vrot.lane.b32.xlu1 %v1698_v30, %s3723_s19  ;;  %2322 = vrot.lane.b32.xlu0 %v2302_v11, %s3724_s20  ;;  %v2370_v30 = vmul.f32 %v4736_v16, %v4751_v53  ;;  %v4992_v11 = vpop.permute.xlu0 %2312 }
 0x688   :  { %v2434_v58 = vpop.permute.xlu1 %2433 }
 0x689   :  { %v2442_v20 = vmul.f32 %v2434_v58, %v4931_v56  ;;  %v1519_v58 = vadd.f32 %v4862_v42, %v1449_v27 }
 0x68a   :  { %1856 = vrot.lane.b32.xlu1 %v1838_v29, %s3725_s0 }
 0x68b   :  { %2462 = vrot.lane.b32.xlu0 %v2442_v20, %s3726_s21  ;;  %v5001_v20 = vpop.permute.xlu0 %1502  ;;  %v1589_v16 = vadd.f32 %v4875_v25, %v1519_v58  ;;  %v2091_v58 = vmul.f32 %v4841_v21, %v4829_v22 }
 0x68d   :  { %v4975_v13 = vpop.permute.xlu1 %1971 }
 0x68e   :  { %1926 = vrot.lane.b32.xlu1 %v1908_v41, %s3726_s21  ;;  %v1559_v41 = vmul.f32 %v4793_v2, %v4800_v40  ;;  %v1450_v2 = vmul.f32 %v4579_v49, %v4778_v62 }
 0x68f   :  { %2692 = vperm.xlu0 %3678, %v4973_v10  }
 0x691   :  { %v2101_v26 = vpop.permute.xlu1 %2100 }
 0x692   :  { %2038 = vrot.lane.b32.xlu1 %v2020_v0, %s3708_s13 }
 0x693   :  { %3681 = vset.pattern.permute.xlu0 %v5215_v32  ;;  %v1489_v32 = vmul.f32 %v4786_v45, %v4800_v40  ;;  %v5011_v45 = vpop.permute.xlu0 %1642 }
 0x695   :  { %v2171_v19 = vpop.permute.xlu1 %2170 }
 0x696   :  { %2248 = vrot.lane.b32.xlu1 %v2230_v4, %s3723_s19  ;;  %v1659_v4 = vadd.f32 %v4886_v34, %v1589_v16  ;;  %v1769_v34 = vmul.f32 %v4807_v39, %v4800_v40 }
 0x697   :  { %v5020_v27 = vpop.permute.xlu0 %1712 }
 0x698   :  { %v1729_v44 = vadd.f32 %v4898_v17, %v1659_v4 }
 0x699   :  { %v2311_v29 = vpop.permute.xlu1 %2310 }
 0x69a   :  { %2388 = vrot.lane.b32.xlu1 %v2370_v30, %s3725_s0  ;;  %v1799_v30 = vadd.f32 %v4906_v31, %v1729_v44  ;;  %v1974_v31 = vmul.f32 %v4523_v33, %v4510_v14  ;;  %v2301_v14 = vmul.f32 %v4859_v7, %v4829_v22 }
 0x69b   :  { %v5029_v39 = vpop.permute.xlu0 %1782 }
 0x69c   :  { %v1869_v25 = vadd.f32 %v4914_v48, %v1799_v30 }
 0x69d   :  { %v1501_v23 = vpop.permute.xlu1 %1500 }
 0x69e   :  { %1508 = vrot.lane.b32.xlu1 %v1489_v32, %s3708_s13  ;;  %v1939_v17 = vadd.f32 %v4923_v52, %v1869_v25  ;;  %v1520_v32 = vadd.f32 %v1501_v23, %v1450_v2  ;;  %v2161_v52 = vmul.f32 %v4850_v38, %v4829_v22  ;;  %v1560_v38 = vmul.f32 %v4903_v63, %v4868_v8 }
 0x6a0   :  { %v1981_v48 = vadd.f32 %v1974_v31, %v1939_v17 }
 0x6a1   :  { %v1571_v0 = vpop.permute.xlu1 %1570 }
 0x6a2   :  { %1578 = vrot.lane.b32.xlu1 %v1559_v41, %s3709_s16  ;;  %v1590_v49 = vadd.f32 %v1571_v0, %v1520_v32  ;;  %v2051_v4 = vadd.f32 %v4938_v28, %v1981_v48  ;;  %v1923_v0 = vpop.permute.xlu0 %1922  ;;  %v1910_v32 = vmul.f32 %v4820_v43, %v4868_v8  ;;  %v2092_v43 = vmul.f32 %v4833_v18, %v4931_v56 }
 0x6a4   :  { %v2121_v33 = vadd.f32 %v2101_v26, %v2051_v4 }
 0x6a5   :  { %v1641_v42 = vpop.permute.xlu1 %1640 }
 0x6a6   :  { %1648 = vrot.lane.b32.xlu1 %v1629_v50, %s3710_s17  ;;  %v1660_v16 = vadd.f32 %v1641_v42, %v1590_v49  ;;  %v1975_v42 = vmul.f32 %v4585_v6, %v4567_v3  ;;  %v2191_v30 = vadd.f32 %v2171_v19, %v2121_v33  ;;  %v5042_v25 = vpop.permute.xlu0 %2104 }
 0x6a8   :  { %v2261_v7 = vadd.f32 %v4949_v55, %v2191_v30 }
 0x6a9   :  { %v1711_v51 = vpop.permute.xlu1 %1710 }
 0x6aa   :  { %1788 = vrot.lane.b32.xlu1 %v1769_v34, %s3724_s20  ;;  %v1730_v23 = vadd.f32 %v1711_v51, %v1660_v16  ;;  %v1770_v51 = vmul.f32 %v4812_v54, %v4868_v8  ;;  %v2331_v19 = vadd.f32 %v2311_v29, %v2261_v7  ;;  %v5051_v63 = vpop.permute.xlu0 %2244  ;;  %v2441_v54 = vmul.f32 %v4878_v24, %v4829_v22 }
 0x6ad   :  { %v1781_v62 = vpop.permute.xlu1 %1780 }
 0x6ae   :  { %2110 = vrot.lane.b32.xlu1 %v2091_v58, %s3709_s16  ;;  %v1800_v50 = vadd.f32 %v1781_v62, %v1730_v23  ;;  %v2401_v58 = vadd.f32 %v4957_v12, %v2331_v19 }
 0x6b0   :  { %v2471_v62 = vadd.f32 %v4965_v37, %v2401_v58  ;;  %v2232_v37 = vmul.f32 %v4946_v1, %v4931_v56 }
 0x6b1   :  { %v1851_v41 = vpop.permute.xlu1 %1850 }
 0x6b2   :  { %2180 = vrot.lane.b32.xlu1 %v2161_v52, %s3710_s17  ;;  %v1870_v21 = vadd.f32 %v1851_v41, %v1800_v50  ;;  %v2372_v50 = vmul.f32 %v4844_v61, %v4931_v56 }
 0x6b5   :  { %v1921_v44 = vpop.permute.xlu1 %1920 }
 0x6b6   :  { %v1940_v2 = vadd.f32 %v1921_v44, %v1870_v21  ;;  %2320 = vrot.lane.b32.xlu1 %v2301_v14, %s3724_s20 }
 0x6b8   :  { %v1982_v28 = vadd.f32 %v1975_v42, %v1940_v2 }
 0x6b9   :  { %v2033_v34 = vpop.permute.xlu1 %2032 }
 0x6ba   :  { %v2052_v26 = vadd.f32 %v2033_v34, %v1982_v28  ;;  %1580 = vrot.lane.b32.xlu1 %v1560_v38, %s3709_s16 }
 0x6bc   :  { %v2122_v3 = vadd.f32 %v4978_v36, %v2052_v26  ;;  %v5218_v26 = vld [vmem:[#allocation9_spill] sm:$0xff] }
 0x6bd   :  { %v2243_v6 = vpop.permute.xlu1 %2242 }
 0x6be   :  { %v2192_v17 = vadd.f32 %v4987_v5, %v2122_v3  ;;  %1790 = vrot.lane.b32.xlu1 %v1770_v51, %s3724_s20  ;;  %v5060_v5 = vpop.permute.xlu0 %2314  ;;  %v1452_v51 = vmul.f32 %v5218_v26, %v4673_v60 }
 0x6c0   :  { %v2262_v55 = vadd.f32 %v2243_v6, %v2192_v17 }
 0x6c1   :  { %v2383_v31 = vpop.permute.xlu1 %2382 }
 0x6c2   :  { %v2332_v49 = vadd.f32 %v4992_v11, %v2262_v55  ;;  %1930 = vrot.lane.b32.xlu1 %v1910_v32, %s3726_s21  ;;  %v5216_v11 = vld [vmem:[#allocation7_spill] sm:$0xff]  ;;  %v2455_v24 = vpop.permute.xlu0 %2454 }
 0x6c3   :  { %v1451_v52 = vmul.f32 %v5216_v11, %v4593_v46 }
 0x6c4   :  { %v2402_v36 = vadd.f32 %v2383_v31, %v2332_v49 }
 0x6c5   :  { %v2453_v29 = vpop.permute.xlu1 %2452  ;;  %v1521_v23 = vadd.f32 %v5001_v20, %v1451_v52 }
 0x6c6   :  { %v2472_v48 = vadd.f32 %v2453_v29, %v2402_v36  ;;  %2460 = vrot.lane.b32.xlu1 %v2441_v54, %s3726_s21  ;;  %v1855_v18 = vpop.permute.xlu0 %1854 }
 0x6c8   :  { %v3477_v12 = vpack.c.bf16 %v2472_v48, %v2471_v62 }
 0x6c9   :  { %v1573_v16 = vpop.permute.xlu1 %1572 }
 0x6ca   :  { %2112 = vrot.lane.b32.xlu1 %v2092_v43, %s3709_s16  ;;  %3478 = vmatprep.subr.bf16.mxu1 %v3477_v12  ;;  %v1591_v4 = vadd.f32 %v1573_v16, %v1521_v23  ;;  %v2037_v33 = vpop.permute.xlu0 %2036 }
 0x6cb   :  { %3480 = vmatpush3.bf16.msra.mxu1 %v3477_v12 }
 0x6cc   :  { %v1661_v46 = vadd.f32 %v5011_v45, %v1591_v4  ;;  %v5217_v45 = vld [vmem:[#allocation8_spill] sm:$0xff] }
 0x6cd   :  { %v1853_v41 = vpop.permute.xlu1 %1852  ;;  %v1976_v7 = vmul.f32 %v5217_v45, %v4625_v35  ;;  %v5219_v35 = vld [vmem:[#allocation10_spill] sm:$0xff] }
 0x6ce   :  { %2252 = vrot.lane.b32.xlu1 %v2232_v37, %s3723_s19  ;;  %v1731_v20 = vadd.f32 %v5020_v27, %v1661_v46  ;;  %v2177_v42 = vpop.permute.xlu0 %2176  ;;  %v1977_v29 = vmul.f32 %v5219_v35, %v4677_v47 }
 0x6d0   :  { %v1801_v44 = vadd.f32 %v5029_v39, %v1731_v20 }
 0x6d1   :  { %v2035_v14 = vpop.permute.xlu1 %2034 }
 0x6d2   :  { %2392 = vrot.lane.b32.xlu1 %v2372_v50, %s3725_s0  ;;  %v1871_v2 = vadd.f32 %v1853_v41, %v1801_v44  ;;  %v2387_v38 = vpop.permute.xlu0 %2386 }
 0x6d4   :  { %v1941_v61 = vadd.f32 %v1923_v0, %v1871_v2 }
 0x6d5   :  { %v2175_v21 = vpop.permute.xlu1 %2174 }
 0x6d6   :  { %2698 = vperm.xlu1 %3680, %v4973_v10   ;;  %v1507_v34 = vpop.permute.xlu0 %1506  ;;  %v1983_v27 = vadd.f32 %v1976_v7, %v1941_v61  ;;  %v5220_v7 = vld [vmem:[#allocation11_spill] sm:$0xff] }
 0x6d8   :  { %v2053_v39 = vadd.f32 %v2035_v14, %v1983_v27 }
 0x6d9   :  { %v2385_v1 = vpop.permute.xlu1 %2384 }
 0x6da   :  { %v1577_v19 = vpop.permute.xlu0 %1576  ;;  %v2123_v58 = vadd.f32 %v5042_v25, %v2053_v39  ;;  %v1454_v39 = vmul.f32 %v4888_v59, %v4800_v40  ;;  %v1979_v59 = vmul.f32 %v4896_v15, %v4829_v22 }
 0x6dc   :  { %v2193_v60 = vadd.f32 %v2175_v21, %v2123_v58 }
 0x6dd   :  { %v1505_v30 = vpop.permute.xlu1 %1504 }
 0x6de   :  { %v1522_v6 = vadd.f32 %v1505_v30, %v1452_v51  ;;  %v1647_v49 = vpop.permute.xlu0 %1646  ;;  %v2263_v16 = vadd.f32 %v5051_v63, %v2193_v60 }
 0x6e0   :  { %v2333_v25 = vadd.f32 %v5060_v5, %v2263_v16 }
 0x6e1   :  { %v1575_v28 = vpop.permute.xlu1 %1574 }
 0x6e2   :  { %v1592_v10 = vadd.f32 %v1575_v28, %v1522_v6  ;;  %v1787_v43 = vpop.permute.xlu0 %1786  ;;  %v2403_v50 = vadd.f32 %v2385_v1, %v2333_v25  ;;  %v1453_v1 = vmul.f32 %v5220_v7, %v4717_v57 }
 0x6e4   :  { %v2473_v20 = vadd.f32 %v2455_v24, %v2403_v50  ;;  %v1523_v51 = vadd.f32 %v1507_v34, %v1453_v1 }
 0x6e5   :  { %v1645_v3 = vpop.permute.xlu1 %1644 }
 0x6e6   :  { %v1662_v32 = vadd.f32 %v1645_v3, %v1592_v10  ;;  %v2109_v23 = vpop.permute.xlu0 %2108  ;;  %v1593_v3 = vadd.f32 %v1577_v19, %v1523_v51  ;;  %v5221_v19 = vld [vmem:[#allocation12_spill] sm:$0xff] }
 0x6e8   :  { %v1663_v27 = vadd.f32 %v1647_v49, %v1593_v3 }
 0x6e9   :  { %v1715_v17 = vpop.permute.xlu1 %1714 }
 0x6ea   :  { %v1732_v55 = vadd.f32 %v1715_v17, %v1662_v32  ;;  %v2179_v46 = vpop.permute.xlu0 %2178 }
 0x6ed   :  { %v1785_v31 = vpop.permute.xlu1 %1784 }
 0x6ee   :  { %v1802_v0 = vadd.f32 %v1785_v31, %v1732_v55  ;;  %v2319_v30 = vpop.permute.xlu0 %2318 }
 0x6f0   :  { %v1872_v54 = vadd.f32 %v1855_v18, %v1802_v0 }
 0x6f1   :  { %v1925_v36 = vpop.permute.xlu1 %1924 }
 0x6f2   :  { %v1942_v62 = vadd.f32 %v1925_v36, %v1872_v54  ;;  %v1719_v63 = vpop.permute.xlu0 %1718 }
 0x6f4   :  { %v1984_v48 = vadd.f32 %v1977_v29, %v1942_v62  ;;  %v1978_v29 = vmul.f32 %v5221_v19, %v4751_v53  ;;  %v1455_v53 = vmul.f32 %v4854_v9, %v4868_v8  ;;  %v1980_v9 = vmul.f32 %v4975_v13, %v4931_v56 }
 0x6f5   :  { %v2107_v12 = vpop.permute.xlu1 %2106  ;;  %v5226_v19 = vmov 0.0  }
 0x6f6   :  { %v2054_v11 = vadd.f32 %v2037_v33, %v1984_v48  ;;  %v1859_v61 = vpop.permute.xlu0 %1858 }
 0x6f8   :  { %v2124_v52 = vadd.f32 %v2107_v12, %v2054_v11 }
 0x6f9   :  { %v2247_v37 = vpop.permute.xlu1 %2246 }
 0x6fa   :  { %v2194_v41 = vadd.f32 %v2177_v42, %v2124_v52  ;;  %v1929_v5 = vpop.permute.xlu0 %1928 }
 0x6fc   :  { %v2264_v4 = vadd.f32 %v2247_v37, %v2194_v41 }
 0x6fd   :  { %v2317_v18 = vpop.permute.xlu1 %2316 }
 0x6fe   :  { %v2334_v14 = vadd.f32 %v2317_v18, %v2264_v4 }
 0x700   :  { %v2404_v47 = vadd.f32 %v2387_v38, %v2334_v14  ;;  %v2041_v38 = vpop.permute.xlu0 %2040 }
 0x701   :  { %v2457_v21 = vpop.permute.xlu1 %2456 }
 0x702   :  { %v2474_v44 = vadd.f32 %v2457_v21, %v2404_v47 }
 0x704   :  { %v3481_v2 = vpack.c.bf16 %v2474_v44, %v2473_v20  ;;  %v2251_v10 = vpop.permute.xlu0 %2250 }
 0x705   :  { %v1717_v28 = vpop.permute.xlu1 %1716 }
 0x706   :  { %3482 = vmatprep.subr.bf16.mxu1 %v3481_v2  ;;  %v1733_v6 = vadd.f32 %v1717_v28, %v1663_v27 }
 0x707   :  { %3484 = vmatpush3.bf16.msra.mxu1 %v3481_v2 }
 0x708   :  { %v1803_v32 = vadd.f32 %v1787_v43, %v1733_v6  ;;  %v2391_v55 = vpop.permute.xlu0 %2390 }
 0x709   :  { %v1857_v33 = vpop.permute.xlu1 %1856 }
 0x70a   :  { %v1873_v0 = vadd.f32 %v1857_v33, %v1803_v32 }
 0x70c   :  { %v1511_v34 = vpop.permute.xlu0 %1510 }
 0x70d   :  { %v1927_v45 = vpop.permute.xlu1 %1926  ;;  %v1525_v21 = vadd.f32 %v1511_v34, %v1455_v53  ;;  %v5225_v34 = vld [vmem:[#allocation6_spill] sm:$0xff] }
 0x70e   :  { %v1943_v57 = vadd.f32 %v1927_v45, %v1873_v0  ;;  %v2856_v53 = vld [vmem:[%s5163_s4 + $0xa0] sm:$0xff] }
 0x710   :  { %v1985_v62 = vadd.f32 %v1978_v29, %v1943_v57  ;;  %v1651_v16 = vpop.permute.xlu0 %1650  ;;  %v5223_v57 = vmov 0.0|0.0   ;;  %v1040_v29 = vld [vmem:[%s5163_s4 + $0x75] ss:$0 sm:$0xff] }
 0x711   :  { %v2039_v42 = vpop.permute.xlu1 %2038 }
 0x712   :  { %v2055_v43 = vadd.f32 %v2039_v42, %v1985_v62 }
 0x714   :  { %v1721_v37 = vpop.permute.xlu0 %1720  ;;  %v2125_v41 = vadd.f32 %v2109_v23, %v2055_v43 }
 0x715   :  { %v2249_v26 = vpop.permute.xlu1 %2248 }
 0x716   :  { %v2195_v14 = vadd.f32 %v2179_v46, %v2125_v41 }
 0x718   :  { %v1861_v47 = vpop.permute.xlu0 %1860  ;;  %v2265_v2 = vadd.f32 %v2249_v26, %v2195_v14  ;;  %v2857_v14 = vld [vmem:[%s5163_s4 + $0xb0] sm:$0x3f] }
 0x719   :  { %v2389_v24 = vpop.permute.xlu1 %2388 }
 0x71d   :  { %v1509_v17 = vpop.permute.xlu1 %1508 }
 0x71e   :  { %v1524_v58 = vadd.f32 %v1509_v17, %v1454_v39 }
 0x721   :  { %v1579_v31 = vpop.permute.xlu1 %1578 }
 0x722   :  { %v1594_v54 = vadd.f32 %v1579_v31, %v1524_v58 }
 0x725   :  { %v1649_v36 = vpop.permute.xlu1 %1648 }
 0x726   :  { %v1664_v35 = vadd.f32 %v1649_v36, %v1594_v54  ;;  %v5222_v36 = vld [vmem:[#allocation4_spill] sm:$0xff] }
 0x728   :  { %v1734_v49 = vadd.f32 %v1719_v63, %v1664_v35  ;;  %v2459_v63 = vpop.permute.xlu0 %2458  ;;  %v5224_v35 = vld [vmem:[#allocation5_spill] sm:$0xff] }
 0x729   :  { %v1789_v60 = vpop.permute.xlu1 %1788 }
 0x72a   :  { %v1804_v48 = vadd.f32 %v1789_v60, %v1734_v49 }
 0x72c   :  { %v1874_v12 = vadd.f32 %v1859_v61, %v1804_v48  ;;  %v2335_v61 = vadd.f32 %v2319_v30, %v2265_v2  ;;  %v2043_v51 = vpop.permute.xlu0 %2042 }
 0x72d   :  { %v2111_v40 = vpop.permute.xlu1 %2110 }
 0x72e   :  { %v1944_v11 = vadd.f32 %v1929_v5, %v1874_v12  ;;  %v2405_v7 = vadd.f32 %v2389_v24, %v2335_v61 }
 0x730   :  { %v1986_v52 = vadd.f32 %v1979_v59, %v1944_v11  ;;  %v2475_v26 = vadd.f32 %v2459_v63, %v2405_v7  ;;  %v2183_v17 = vpop.permute.xlu0 %2182 }
 0x731   :  { %v2181_v25 = vpop.permute.xlu1 %2180 }
 0x732   :  { %v2056_v4 = vadd.f32 %v2041_v38, %v1986_v52 }
 0x734   :  { %v2126_v18 = vadd.f32 %v2111_v40, %v2056_v4  ;;  %v2323_v24 = vpop.permute.xlu0 %2322 }
 0x735   :  { %v2321_v50 = vpop.permute.xlu1 %2320 }
 0x736   :  { %v2196_v20 = vadd.f32 %v2181_v25, %v2126_v18 }
 0x738   :  { %v2266_v22 = vadd.f32 %v2251_v10, %v2196_v20  ;;  %v2463_v13 = vpop.permute.xlu0 %2462 }
 0x739   :  { %v1581_v44 = vpop.permute.xlu1 %1580 }
 0x73a   :  { %v1595_v28 = vadd.f32 %v1581_v44, %v1525_v21  ;;  %v2336_v23 = vadd.f32 %v2321_v50, %v2266_v22  ;;  %v2855_v50 = vld [vmem:[%s5163_s4 + $0x90] sm:$0xc0]  ;;  %v2863_v22 = vrot.slane %v2856_v53, 6 }
 0x73c   :  { %v1665_v15 = vadd.f32 %v1651_v16, %v1595_v28  ;;  %v2406_v46 = vadd.f32 %v2391_v55, %v2336_v23  ;;  %v2862_v28 = vrot.slane %v2855_v50, 6  ;;  %v2693_v23 = vpop.permute.xlu0 %2692 }
 0x73d   :  { %v1791_v33 = vpop.permute.xlu1 %1790 }
 0x73e   :  { %v1735_v45 = vadd.f32 %v1721_v37, %v1665_v15  ;;  %v2865_v15 = vrot.slane %v2857_v14, 6  ;;  %v2864_v7 = vsel %vm154_vm0, %v2862_v28, %v2863_v22 }
 0x740   :  { %v1805_v5 = vadd.f32 %v1791_v33, %v1735_v45 }
 0x741   :  { %v1931_v42 = vpop.permute.xlu1 %1930 }
 0x742   :  { %v1875_v1 = vadd.f32 %v1861_v47, %v1805_v5 }
 0x744   :  { %v1945_v8 = vadd.f32 %v1931_v42, %v1875_v1  ;;  %v5227_v42 = vld [vmem:[#allocation3_spill] sm:$0xff]  ;;  %v2866_v1 = vsel %vm154_vm0, %v2863_v22, %v2865_v15 }
 0x745   :  { %v2461_v38 = vpop.permute.xlu1 %2460  ;;  %vm2694_vm6 = vcmp.eq.s32.totalorder %v2693_v23, %v5227_v42 }
 0x746   :  { %v1987_v3 = vadd.f32 %v1980_v9, %v1945_v8  ;;  %v2476_v27 = vadd.f32 %v2461_v38, %v2406_v46  ;;  %v3504_v46 = vpack.c.bf16 %v2866_v1, %v2864_v7  ;;  %v3113_v38 = vsel %vm2694_vm6, 1.0, %v5226_v19 }
 0x748   :  { %v3485_v6 = vpack.c.bf16 %v2476_v27, %v2475_v26  ;;  %v2057_v10 = vadd.f32 %v2043_v51, %v1987_v3  ;;  %v2852_v26 = vld [vmem:[%s5163_s4 + $0x70] sm:$0xc0]  ;;  %v2853_v3 = vld [vmem:[%s5163_s4 + $0x80] sm:$0xff]  ;;  %v2854_v27 = vld [vmem:[%s5163_s4 + $0x90] sm:$0x3f] }
 0x749   :  { %v2113_v30 = vpop.permute.xlu1 %2112 }
 0x74a   :  { %v2127_v39 = vadd.f32 %v2113_v30, %v2057_v10  ;;  %3486 = vmatprep.subr.bf16.mxu1 %v3485_v6  ;;  %v2946_v10 = vrot.slane %v2853_v3, 6 }
 0x74b   :  { %3488 = vmatpush3.bf16.msra.mxu1 %v3485_v6  ;;  %v2945_v6 = vrot.slane %v2852_v26, 6 }
 0x74c   :  { %v2197_v32 = vadd.f32 %v2183_v17, %v2127_v39  ;;  %v2948_v17 = vrot.slane %v2854_v27, 6 }
 0x74d   :  { %v2253_v31 = vpop.permute.xlu1 %2252  ;;  %v2947_v30 = vsel %vm154_vm0, %v2945_v6, %v2946_v10 }
 0x74e   :  { %v2267_v58 = vadd.f32 %v2253_v31, %v2197_v32  ;;  %v2949_v39 = vsel %vm154_vm0, %v2946_v10, %v2948_v17 }
 0x74f   :  { %v3507_v32 = vpack.c.bf16 %v2949_v39, %v2947_v30 }
 0x750   :  { %v2337_v0 = vadd.f32 %v2323_v24, %v2267_v58 }
 0x751   :  { %v2393_v54 = vpop.permute.xlu1 %2392 }
 0x752   :  { %v2407_v56 = vadd.f32 %v2393_v54, %v2337_v0 }
 0x754   :  { %v2477_v55 = vadd.f32 %v2463_v13, %v2407_v56  ;;  %v2858_v13 = vld [vmem:[%s5163_s4 + $0xb6] ss:$0 sm:$0xff] }
 0x755   :  { %v2699_v61 = vpop.permute.xlu1 %2698 }
 0x756   :  { %3396 = vmatprep.subr.mxu1 %v2477_v55  ;;  %vm2700_vm4 = vcmp.eq.s32.totalorder %v2699_v61, %v5227_v42 }
 0x757   :  { %3397 = vmatpush3.msra.mxu1 %v2477_v55  ;;  %v3114_v9 = vsel %vm2700_vm4, 1.0, %v5226_v19 }
 0x758   :  { %3399 = vmatmul.mubr.msk.f32.vlgmr.msra.gmra.mrb[32].mxu1 %vm909_vm14, %v5222_v36  ;;  %3489 = vmatprep.subr.bf16.mxu1 %v5223_v57 }
 0x759   :  { %3401 = vmatprep.mubr.msk.f32.mxu1 %vm909_vm14, %v5224_v35 }
 0x75c   :  { %3402 = vmatmul.mubr.msk.f32.gmra.mrb[34].mxu1 %vm909_vm14, %v5225_v34 }
 0x75d   :  { %3412 = vmatprep.mubr.msk.f32.mxu1 %vm3702_vm2, %v5226_v19 }
 0x82b   :  { %v3400_v49 = vpop.f32.mrb[32].mxu1 }
 0x82c   :  { %v2671_v60 = vadd.f32 %v3400_v49, %v1040_v29  ;;  %v2651_v62 = vpop.f32.mrb[33].mxu1 }
 0x82d   :  { %v2670_v48 = vadd.f32 %v2651_v62, %v1040_v29 }
 0x82e   :  { %v2675_v12 = vmul.f32 0.5, %v2671_v60 }
 0x82f   :  { %v2674_v16 = vmul.f32 0.5, %v2670_v48  ;;  %v3403_v40 = vpop.f32.mrb[34].mxu1 }
 0x830   :  { %3690 = vtanh.f32 %v2675_v12  ;;  %v2673_v59 = vadd.f32 %v3403_v40, %v1040_v29  ;;  %v2661_v43 = vpop.f32.mrb[35].mxu1 }
 0x831   :  { %3692 = vtanh.f32 %v2674_v16  ;;  %v2672_v11 = vadd.f32 %v2661_v43, %v1040_v29 }
 0x832   :  { %v2677_v52 = vmul.f32 0.5, %v2673_v59 }
 0x833   :  { %v2676_v37 = vmul.f32 0.5, %v2672_v11 }
 0x834   :  { %3694 = vtanh.f32 %v2677_v52 }
 0x835   :  { %3696 = vtanh.f32 %v2676_v37 }
 0x83a   :  { %v3691_v25 = vpop.eup %3690 }
 0x83b   :  { %v3693_v41 = vpop.eup %3692  ;;  %v2683_v4 = vmul.f32 0.5, %v3691_v25 }
 0x83c   :  { %v2682_v18 = vmul.f32 0.5, %v3693_v41 }
 0x83d   :  { %v2687_v47 = vadd.f32 0.5, %v2683_v4 }
 0x83e   :  { %v3695_v21 = vpop.eup %3694  ;;  %v2686_v20 = vadd.f32 0.5, %v2682_v18 }
 0x83f   :  { %v3697_v44 = vpop.eup %3696  ;;  %v2685_v2 = vmul.f32 0.5, %v3695_v21 }
 0x840   :  { %v3490_v63 = vpack.c.bf16 %v2687_v47, %v2686_v20  ;;  %v2684_v33 = vmul.f32 0.5, %v3697_v44 }
 0x841   :  { %v2689_v45 = vadd.f32 0.5, %v2685_v2 }
 0x842   :  { %v2688_v5 = vadd.f32 0.5, %v2684_v33  ;;  %3491 = vmatpush3.bf16.msra.mxu1 %v3490_v63  ;;  %3498 = vmatpush3.bf16.msra.mxu0 %v3490_v63 }
 0x843   :  { %3492 = vmatprep.subr.bf16.mxu1 %v5223_v57  ;;  %3499 = vmatprep.subr.bf16.mxu0 %v5223_v57 }
 0x844   :  { %v3493_v51 = vpack.c.bf16 %v2689_v45, %v2688_v5 }
 0x846   :  { %3495 = vmatpush3.bf16.msk.msra.mxu1 %vm3852_vm5, %v3493_v51  ;;  %3502 = vmatpush3.bf16.msk.msra.mxu0 %vm3852_vm5, %v3493_v51 }
 0x847   :  { %3503 = vmatprep.subr.bf16.mxu1 %v5223_v57 }
 0x849   :  { %3413 = vmatmul.mubr.msk.f32.vlgmr.msra.gmra.mrb[36].mxu1 %vm265_vm7, %v3113_v38  ;;  %3424 = vmatmul.mubr.msk.f32.vlgmr.msra.gmra.mrb[56].mxu0 %vm265_vm7, %v3114_v9 }
 0x84a   :  { %3505 = vmatpush3.bf16.msra.mxu1 %v3504_v46  ;;  %3430 = vmatprep.mubr.msk.f32.mxu1 %vm3702_vm2, %v5226_v19 }
 0x84b   :  { %3506 = vmatprep.subr.bf16.mxu1 %v5223_v57 }
 0x91c   :  { %v2775_v24 = vpop.f32.mrb[36].mxu1  ;;  %v2848_v31 = vpop.f32.mrb[56].mxu0 }
 0x91d   :  { %v3414_v58 = vpop.f32.mrb[37].mxu1  ;;  %3431 = vmatmul.mubr.msk.f32.vlgmr.msra.gmra.mrb[38].mxu1 %vm402_vm15, %v2848_v31  ;;  %v3425_v0 = vpop.f32.mrb[57].mxu0 }
 0x91e   :  { %3508 = vmatpush3.bf16.msra.mxu1 %v3507_v32  ;;  %3437 = vmatprep.mubr.msk.f32.mxu1 %vm3702_vm2, %v5226_v19 }
 0x921   :  { %3438 = vmatmul.mubr.msk.f32.vlgmr.msra.gmra.mrb[40].mxu1 %vm402_vm15, %v2775_v24 }
 0x9f0   :  { %v2938_v54 = vpop.f32.mrb[38].mxu1 }
 0x9f1   :  { %v3432_v56 = vpop.f32.mrb[39].mxu1 }
 0x9f4   :  { %v3021_v55 = vpop.f32.mrb[40].mxu1 }
 0x9f5   :  { %v3022_v36 = vadd.f32 %v3021_v55, %v2938_v54  ;;  %v3439_v57 = vpop.f32.mrb[41].mxu1 }
 0x9f7   :  { %v3025_v35 = vadd.f32 %v3022_v36, %v2858_v13 }
 0x9f9   :  { %v3026_v34 = vmul.f32 0.5, %v3025_v35 }
 0x9fb   :  { %3698 = vtanh.f32 %v3026_v34 }
 0xa05   :  { %v3699_v29 = vpop.eup %3698 }
 0xa06   :  { %v3028_v49 = vmul.f32 0.5, %v3699_v29 }
 0xa08   :  { %v3029_v60 = vadd.f32 0.5, %v3028_v49 }
 0xa0a   :  { %3030 = vst.msk [vmem:[%s5167_s5] sm:$0xff] %vm132_vm1, %v3029_v60 }

</bundles_post_ra>
